<compile_context>
chip_gen: v6e
topology: v6e:2x2x1
jax: 0.10.0
libtpu: 0.0.40
codegen_flags: <defaults>
</compile_context>

<pallas_src>
import functools
import math

import jax
import jax.numpy as jnp
from jax import lax
from jax.experimental import pallas as pl
from jax.experimental.pallas import tpu as pltpu

LN_EPS = 1e-5
_INV_SQRT2 = 1.0 / math.sqrt(2.0)


def _layernorm(x, g, b):
    # two-pass statistics (matches torch.nn.LayerNorm numerics closely)
    mean = jnp.mean(x, axis=-1, keepdims=True)
    xc = x - mean
    var = jnp.mean(xc * xc, axis=-1, keepdims=True)
    return xc * lax.rsqrt(var + LN_EPS) * g + b


# ---------------------------------------------------------------------------
# Fully fused forward kernel: whole batch in one grid step.
# ---------------------------------------------------------------------------
def _fused_kernel(x_ref, eps_ref, vec_ref, wqkv_ref, wo_ref, w1_ref, w2_ref,
                  wib_ref, bib_ref, out_ref, *,
                  depth, heads, batch, seq, dim, mlp_dim):
    dh = dim // heads
    M = batch * seq
    x = x_ref[...]                                  # (M, D) f32, stays on-chip

    for l in range(depth):                          # statically unrolled (depth small)
        lv = vec_ref[l]                             # (7, W) f32 per-layer vector slab
        ln1g, ln1b = lv[0:1, 0:dim], lv[1:2, 0:dim]
        ln2g, ln2b = lv[2:3, 0:dim], lv[3:4, 0:dim]
        bo, b2 = lv[4:5, 0:dim], lv[5:6, 0:dim]
        b1 = lv[6:7, 0:mlp_dim]

        # ---------- Residual(PreNorm(Attention)) ----------
        xn = _layernorm(x, ln1g, ln1b).astype(jnp.bfloat16)
        xh = jnp.broadcast_to(xn[None], (heads, M, dim))
        # ONE fused qkv projection per layer (attention scale folded into Wq)
        qkv_h = jnp.einsum('hmd,hde->hme', xh, wqkv_ref[l],
                           preferred_element_type=jnp.float32)    # (h, M, 3*dh)
        # regroup rows per batch element for the (N, N) attention matmuls
        qkv_g = jnp.concatenate(
            [qkv_h[:, b * seq:(b + 1) * seq, :] for b in range(batch)],
            axis=0)                                               # (B*h, N, 3*dh)
        q = qkv_g[:, :, 0:dh]
        k = qkv_g[:, :, dh:2 * dh]
        v = qkv_g[:, :, 2 * dh:3 * dh]
        dots = jnp.einsum('gid,gjd->gij', q, k,
                          preferred_element_type=jnp.float32)     # (B*h, N, N)
        dots = dots - jnp.max(dots, axis=-1, keepdims=True)
        e = jnp.exp(dots)
        attn = e * pl.reciprocal(jnp.sum(e, axis=-1, keepdims=True), approx=True)
        ho = jnp.einsum('gij,gjd->gid', attn, v,
                        preferred_element_type=jnp.float32)       # (B*h, N, dh)
        # rearrange 'b h n d -> (b n) (h d)' via static slices + concatenates
        rows = [jnp.concatenate([ho[b * heads + h] for h in range(heads)], axis=-1)
                for b in range(batch)]
        ho_cat = jnp.concatenate(rows, axis=0).astype(jnp.bfloat16)   # (M, D)
        # ONE output-projection matmul
        x = x + jnp.dot(ho_cat, wo_ref[l],
                        preferred_element_type=jnp.float32) + bo

        # ---------- Residual(PreNorm(FeedForward)) ----------
        xn2 = _layernorm(x, ln2g, ln2b).astype(jnp.bfloat16)
        h1 = jnp.dot(xn2, w1_ref[l], preferred_element_type=jnp.float32) + b1
        h1 = 0.5 * h1 * (1.0 + lax.erf(h1 * _INV_SQRT2))          # exact erf-GELU
        y = jnp.dot(h1.astype(jnp.bfloat16), w2_ref[l],
                    preferred_element_type=jnp.float32) + b2
        x = x + y

    # ---------- InformationBottleneck head ----------
    bib = bib_ref[...]                              # (4, D) f32; fc_std bias has -5 folded
    henc = jnp.maximum(
        jnp.dot(x.astype(jnp.bfloat16), wib_ref[0],
                preferred_element_type=jnp.float32) + bib[0:1], 0.0)
    hb = henc.astype(jnp.bfloat16)
    mu = jnp.dot(hb, wib_ref[1], preferred_element_type=jnp.float32) + bib[1:2]
    pre = jnp.dot(hb, wib_ref[2], preferred_element_type=jnp.float32) + bib[2:3]
    std = jnp.logaddexp(pre, 0.0)                   # softplus(fc_std(h) - 5)
    z = mu + eps_ref[...] * std                     # reparameterize
    xrec = jnp.dot(z.astype(jnp.bfloat16), wib_ref[3],
                   preferred_element_type=jnp.float32) + bib[3:4]
    # lane-dense packed output: (M, 4*D) = (16, 128) -> unmasked full-lane stores
    out_ref[...] = jnp.concatenate([z, xrec, mu, std], axis=-1)


# ---------------------------------------------------------------------------
# Wrapper: single pallas_call for the whole model
# ---------------------------------------------------------------------------
def transformer_ib_forward(x, params, eps, heads):
    B, N, D = x.shape
    depth = int(params["vec"].shape[0])
    mlp_dim = int(params["w1"].shape[-1])
    M = B * N

    kernel = functools.partial(_fused_kernel, depth=depth, heads=heads,
                               batch=B, seq=N, dim=D, mlp_dim=mlp_dim)

    args = (x.reshape(M, D), eps.reshape(M, D),
            params["vec"], params["wqkv_h"], params["wo"],
            params["w1"], params["w2"], params["wib"], params["bib"])

    def full_spec(a):
        nd = a.ndim
        return pl.BlockSpec(a.shape, lambda i, _nd=nd: (0,) * _nd)

    out = pl.pallas_call(
        kernel,
        out_shape=jax.ShapeDtypeStruct((M, 4 * D), jnp.float32),
        grid=(1,),
        in_specs=[full_spec(a) for a in args],
        out_specs=pl.BlockSpec((M, 4 * D), lambda i: (0, 0)),
        compiler_params=pltpu.CompilerParams(
            dimension_semantics=("arbitrary",)),
    )(*args)

    out = out.reshape(B, N, 4 * D)
    z = out[..., 0:D]
    x_rec = out[..., D:2 * D]
    mu = out[..., 2 * D:3 * D]
    std = out[..., 3 * D:4 * D]
    return z, x_rec, mu, std


# ---------------------------------------------------------------------------
# Deterministic parameter init (PyTorch-style uniform bounds; synthetic weights)
# Weights stored pre-transposed ((in, out) so y = x @ W_t + b); qkv stored
# per-head (heads, D, 3*dh) with the attention scale folded into Wq (f32,
# before the bf16 cast); the "-5" of fc_std folded into its bias.
# ---------------------------------------------------------------------------
def _uniform(key, shape, fan_in):
    bound = 1.0 / math.sqrt(fan_in)
    return jax.random.uniform(key, shape, jnp.float32, -bound, bound)


def init_params(key, dim, depth, heads, mlp_dim):
    dh = dim // heads
    scale = dim ** (-0.5)          # matches reference: self.scale = dim ** (-0.5)
    W = max(dim, mlp_dim)

    vec, wqkv_h, wo, w1, w2 = [], [], [], [], []
    for _ in range(depth):
        key, kqkv, ko, kob, k1, k1b, k2, k2b = jax.random.split(key, 8)
        wqkv_t = _uniform(kqkv, (dim, 3 * dim), dim)           # to_qkv (no bias)
        wo_t = _uniform(ko, (dim, dim), dim)
        bo_l = _uniform(kob, (dim,), dim)
        w1_t = _uniform(k1, (dim, mlp_dim), dim)
        b1_l = _uniform(k1b, (mlp_dim,), dim)
        w2_t = _uniform(k2, (mlp_dim, dim), mlp_dim)
        b2_l = _uniform(k2b, (dim,), mlp_dim)

        wq = wqkv_t[:, 0 * dim:1 * dim].reshape(dim, heads, dh).transpose(1, 0, 2) * scale
        wk = wqkv_t[:, 1 * dim:2 * dim].reshape(dim, heads, dh).transpose(1, 0, 2)
        wv = wqkv_t[:, 2 * dim:3 * dim].reshape(dim, heads, dh).transpose(1, 0, 2)
        wqkv_h.append(jnp.concatenate([wq, wk, wv], axis=-1))  # (heads, D, 3*dh)
        wo.append(wo_t)
        w1.append(w1_t)
        w2.append(w2_t)

        pad = lambda v_: jnp.pad(v_, (0, W - v_.shape[0]))
        vec.append(jnp.stack([pad(jnp.ones((dim,), jnp.float32)),   # ln1 gamma
                              pad(jnp.zeros((dim,), jnp.float32)),  # ln1 beta
                              pad(jnp.ones((dim,), jnp.float32)),   # ln2 gamma
                              pad(jnp.zeros((dim,), jnp.float32)),  # ln2 beta
                              pad(bo_l), pad(b2_l), pad(b1_l)]))

    key, ke, keb, km, kmb, ks, ksb, kd, kdb = jax.random.split(key, 9)
    we_t = _uniform(ke, (dim, dim), dim);   be = _uniform(keb, (dim,), dim)
    wmu_t = _uniform(km, (dim, dim), dim);  bmu = _uniform(kmb, (dim,), dim)
    wstd_t = _uniform(ks, (dim, dim), dim); bstd = _uniform(ksb, (dim,), dim)
    wdec_t = _uniform(kd, (dim, dim), dim); bdec = _uniform(kdb, (dim,), dim)

    bf = lambda a: a.astype(jnp.bfloat16)
    return dict(
        vec=jnp.stack(vec),                                # (depth, 7, W) f32
        wqkv_h=bf(jnp.stack(wqkv_h)),                      # (depth, h, D, 3*dh) bf16
        wo=bf(jnp.stack(wo)),                              # (depth, D, D) bf16
        w1=bf(jnp.stack(w1)),                              # (depth, D, mlp) bf16
        w2=bf(jnp.stack(w2)),                              # (depth, mlp, D) bf16
        wib=bf(jnp.stack([we_t, wmu_t, wstd_t, wdec_t])),  # (4, D, D) bf16
        bib=jnp.stack([be, bmu, bstd - 5.0, bdec]),        # (4, D) f32; -5 folded
    )


if __name__ == "__main__":
    B, N, D = 2, 8, 32
    heads, mlp_dim, depth = 4, 64, 2   # dropout = 0.0 (identity)

    root = jax.random.PRNGKey(0)
    kx, keps, kp = jax.random.split(root, 3)
    x = jax.random.normal(kx, (B, N, D), jnp.float32)
    eps = jax.random.normal(keps, (B, N, D), jnp.float32)   # reparameterization noise
    params = init_params(kp, D, depth, heads, mlp_dim)

    fwd = jax.jit(functools.partial(transformer_ib_forward, heads=heads))
    z, x_rec, mu, std = fwd(x, params, eps)
    jax.block_until_ready((z, x_rec, mu, std))

    assert z.shape == (B, N, D) and x_rec.shape == (B, N, D)
    assert mu.shape == (B, N, D) and std.shape == (B, N, D)
    assert all(bool(jnp.all(jnp.isfinite(t))) for t in (z, x_rec, mu, std))
    print("KERNEL_OK")
</pallas_src>

<mosaic_0001>
module attributes {stable_mosaic.version = 11 : i64} {
  func.func @_fused_kernel(%arg0: i32, %arg1: memref<16x32xf32, #tpu.memory_space<vmem>>, %arg2: memref<16x32xf32, #tpu.memory_space<vmem>>, %arg3: memref<2x7x64xf32, #tpu.memory_space<vmem>>, %arg4: memref<2x4x32x24xbf16, #tpu.memory_space<vmem>>, %arg5: memref<2x32x32xbf16, #tpu.memory_space<vmem>>, %arg6: memref<2x32x64xbf16, #tpu.memory_space<vmem>>, %arg7: memref<2x64x32xbf16, #tpu.memory_space<vmem>>, %arg8: memref<4x32x32xbf16, #tpu.memory_space<vmem>>, %arg9: memref<4x32xf32, #tpu.memory_space<vmem>>, %arg10: memref<16x128xf32, #tpu.memory_space<vmem>>) attributes {dimension_semantics = [#tpu.dimension_semantics<arbitrary>], iteration_bounds = array<i64: 1>, scalar_prefetch = 0 : i64, scratch_operands = 0 : i64, tpu.core_type = #tpu.core_type<tc>, window_params = [{pipeline_mode = #tpu.pipeline_mode<synchronous>, transform_indices = @transform_0, window_bounds = array<i64: 16, 32>}, {pipeline_mode = #tpu.pipeline_mode<synchronous>, transform_indices = @transform_1, window_bounds = array<i64: 16, 32>}, {pipeline_mode = #tpu.pipeline_mode<synchronous>, transform_indices = @transform_2, window_bounds = array<i64: 2, 7, 64>}, {pipeline_mode = #tpu.pipeline_mode<synchronous>, transform_indices = @transform_3, window_bounds = array<i64: 2, 4, 32, 24>}, {pipeline_mode = #tpu.pipeline_mode<synchronous>, transform_indices = @transform_4, window_bounds = array<i64: 2, 32, 32>}, {pipeline_mode = #tpu.pipeline_mode<synchronous>, transform_indices = @transform_5, window_bounds = array<i64: 2, 32, 64>}, {pipeline_mode = #tpu.pipeline_mode<synchronous>, transform_indices = @transform_6, window_bounds = array<i64: 2, 64, 32>}, {pipeline_mode = #tpu.pipeline_mode<synchronous>, transform_indices = @transform_7, window_bounds = array<i64: 4, 32, 32>}, {pipeline_mode = #tpu.pipeline_mode<synchronous>, transform_indices = @transform_8, window_bounds = array<i64: 4, 32>}, {pipeline_mode = #tpu.pipeline_mode<synchronous>, transform_indices = @transform_9, window_bounds = array<i64: 16, 128>}]} {
    %c0 = arith.constant 0 : index
    %c0_0 = arith.constant 0 : index
    %0 = vector.load %arg1[%c0, %c0_0] : memref<16x32xf32, #tpu.memory_space<vmem>>, vector<16x32xf32>
    %c0_1 = arith.constant 0 : index
    %c0_2 = arith.constant 0 : index
    %c0_3 = arith.constant 0 : index
    %1 = vector.load %arg3[%c0_1, %c0_2, %c0_3] : memref<2x7x64xf32, #tpu.memory_space<vmem>>, vector<1x7x64xf32>
    %2 = vector.shape_cast %1 : vector<1x7x64xf32> to vector<7x64xf32>
    %3 = vector.extract_strided_slice %2 {offsets = [0, 0], sizes = [1, 32], strides = [1, 1]} : vector<7x64xf32> to vector<1x32xf32>
    %4 = vector.extract_strided_slice %2 {offsets = [1, 0], sizes = [1, 32], strides = [1, 1]} : vector<7x64xf32> to vector<1x32xf32>
    %5 = vector.extract_strided_slice %2 {offsets = [2, 0], sizes = [1, 32], strides = [1, 1]} : vector<7x64xf32> to vector<1x32xf32>
    %6 = vector.extract_strided_slice %2 {offsets = [3, 0], sizes = [1, 32], strides = [1, 1]} : vector<7x64xf32> to vector<1x32xf32>
    %7 = vector.extract_strided_slice %2 {offsets = [4, 0], sizes = [1, 32], strides = [1, 1]} : vector<7x64xf32> to vector<1x32xf32>
    %8 = vector.extract_strided_slice %2 {offsets = [5, 0], sizes = [1, 32], strides = [1, 1]} : vector<7x64xf32> to vector<1x32xf32>
    %9 = vector.extract_strided_slice %2 {offsets = [6, 0], sizes = [1, 64], strides = [1, 1]} : vector<7x64xf32> to vector<1x64xf32>
    %cst = arith.constant dense<0.000000e+00> : vector<16xf32>
    %10 = vector.multi_reduction <add>, %0, %cst [1] : vector<16x32xf32> to vector<16xf32>
    %11 = vector.shape_cast %10 : vector<16xf32> to vector<16x1xf32>
    %cst_4 = arith.constant 3.200000e+01 : f32
    %12 = vector.broadcast %cst_4 : f32 to vector<16x1xf32>
    %13 = arith.divf %11, %12 : vector<16x1xf32>
    %14 = vector.broadcast %13 : vector<16x1xf32> to vector<16x32xf32>
    %15 = arith.subf %0, %14 : vector<16x32xf32>
    %16 = arith.mulf %15, %15 : vector<16x32xf32>
    %cst_5 = arith.constant dense<0.000000e+00> : vector<16xf32>
    %17 = vector.multi_reduction <add>, %16, %cst_5 [1] : vector<16x32xf32> to vector<16xf32>
    %18 = vector.shape_cast %17 : vector<16xf32> to vector<16x1xf32>
    %cst_6 = arith.constant 3.200000e+01 : f32
    %19 = vector.broadcast %cst_6 : f32 to vector<16x1xf32>
    %20 = arith.divf %18, %19 : vector<16x1xf32>
    %cst_7 = arith.constant 9.99999974E-6 : f32
    %21 = vector.broadcast %cst_7 : f32 to vector<16x1xf32>
    %22 = arith.addf %20, %21 : vector<16x1xf32>
    %23 = math.rsqrt %22 : vector<16x1xf32>
    %24 = vector.broadcast %23 : vector<16x1xf32> to vector<16x32xf32>
    %25 = arith.mulf %15, %24 : vector<16x32xf32>
    %26 = vector.broadcast %3 : vector<1x32xf32> to vector<16x32xf32>
    %27 = arith.mulf %25, %26 : vector<16x32xf32>
    %28 = vector.broadcast %4 : vector<1x32xf32> to vector<16x32xf32>
    %29 = arith.addf %27, %28 : vector<16x32xf32>
    %30 = arith.truncf %29 : vector<16x32xf32> to vector<16x32xbf16>
    %31 = vector.shape_cast %30 : vector<16x32xbf16> to vector<1x16x32xbf16>
    %32 = vector.shape_cast %31 : vector<1x16x32xbf16> to vector<1x16x32xbf16>
    %33 = vector.broadcast %32 : vector<1x16x32xbf16> to vector<4x16x32xbf16>
    %c0_8 = arith.constant 0 : index
    %c0_9 = arith.constant 0 : index
    %c0_10 = arith.constant 0 : index
    %c0_11 = arith.constant 0 : index
    %34 = vector.load %arg4[%c0_8, %c0_9, %c0_10, %c0_11] : memref<2x4x32x24xbf16, #tpu.memory_space<vmem>>, vector<1x4x32x24xbf16>
    %35 = vector.shape_cast %34 : vector<1x4x32x24xbf16> to vector<4x32x24xbf16>
    "tpu.trace_start"() <{level = 10 : i32, message = "hmd,hde->hme"}> : () -> ()
    %cst_12 = arith.constant dense<0.000000e+00> : vector<4x16x24xf32>
    %36 = tpu.matmul %33, %35, %cst_12 {dimension_numbers = #tpu.dot_dimension_numbers<[2], [1], [1], [2], [0, 0, 0, 1, 1, 2], [0], [0]>} : vector<4x16x32xbf16>, vector<4x32x24xbf16>, vector<4x16x24xf32> -> vector<4x16x24xf32>
    "tpu.trace_stop"() : () -> ()
    %37 = vector.extract_strided_slice %36 {offsets = [0, 0, 0], sizes = [4, 8, 24], strides = [1, 1, 1]} : vector<4x16x24xf32> to vector<4x8x24xf32>
    %38 = vector.extract_strided_slice %36 {offsets = [0, 8, 0], sizes = [4, 8, 24], strides = [1, 1, 1]} : vector<4x16x24xf32> to vector<4x8x24xf32>
    %39 = tpu.concatenate %37, %38 in 0 : vector<4x8x24xf32>, vector<4x8x24xf32> -> vector<8x8x24xf32>
    %40 = vector.extract_strided_slice %39 {offsets = [0, 0, 0], sizes = [8, 8, 8], strides = [1, 1, 1]} : vector<8x8x24xf32> to vector<8x8x8xf32>
    %41 = vector.extract_strided_slice %39 {offsets = [0, 0, 8], sizes = [8, 8, 8], strides = [1, 1, 1]} : vector<8x8x24xf32> to vector<8x8x8xf32>
    %42 = vector.extract_strided_slice %39 {offsets = [0, 0, 16], sizes = [8, 8, 8], strides = [1, 1, 1]} : vector<8x8x24xf32> to vector<8x8x8xf32>
    "tpu.trace_start"() <{level = 10 : i32, message = "gid,gjd->gij"}> : () -> ()
    %cst_13 = arith.constant dense<0.000000e+00> : vector<8x8x8xf32>
    %43 = tpu.matmul %40, %41, %cst_13 {dimension_numbers = #tpu.dot_dimension_numbers<[2], [2], [1], [1], [0, 0, 0, 1, 1, 1], [0], [0]>} : vector<8x8x8xf32>, vector<8x8x8xf32>, vector<8x8x8xf32> -> vector<8x8x8xf32>
    "tpu.trace_stop"() : () -> ()
    %cst_14 = arith.constant dense<0xFF800000> : vector<8x8xf32>
    %44 = vector.multi_reduction <maximumf>, %43, %cst_14 [2] : vector<8x8x8xf32> to vector<8x8xf32>
    %45 = vector.shape_cast %44 : vector<8x8xf32> to vector<8x8x1xf32>
    %46 = vector.broadcast %45 : vector<8x8x1xf32> to vector<8x8x8xf32>
    %47 = arith.subf %43, %46 : vector<8x8x8xf32>
    %48 = math.exp %47 : vector<8x8x8xf32>
    %cst_15 = arith.constant dense<0.000000e+00> : vector<8x8xf32>
    %49 = vector.multi_reduction <add>, %48, %cst_15 [2] : vector<8x8x8xf32> to vector<8x8xf32>
    %50 = vector.shape_cast %49 : vector<8x8xf32> to vector<8x8x1xf32>
    %51 = tpu.reciprocal %50 {approx = true} : vector<8x8x1xf32> -> vector<8x8x1xf32>
    %52 = vector.broadcast %51 : vector<8x8x1xf32> to vector<8x8x8xf32>
    %53 = arith.mulf %48, %52 : vector<8x8x8xf32>
    "tpu.trace_start"() <{level = 10 : i32, message = "gij,gjd->gid"}> : () -> ()
    %cst_16 = arith.constant dense<0.000000e+00> : vector<8x8x8xf32>
    %54 = tpu.matmul %53, %42, %cst_16 {dimension_numbers = #tpu.dot_dimension_numbers<[2], [1], [1], [2], [0, 0, 0, 1, 1, 2], [0], [0]>} : vector<8x8x8xf32>, vector<8x8x8xf32>, vector<8x8x8xf32> -> vector<8x8x8xf32>
    "tpu.trace_stop"() : () -> ()
    %55 = vector.extract_strided_slice %54 {offsets = [0, 0, 0], sizes = [1, 8, 8], strides = [1, 1, 1]} : vector<8x8x8xf32> to vector<1x8x8xf32>
    %56 = vector.shape_cast %55 : vector<1x8x8xf32> to vector<8x8xf32>
    %57 = vector.extract_strided_slice %54 {offsets = [1, 0, 0], sizes = [1, 8, 8], strides = [1, 1, 1]} : vector<8x8x8xf32> to vector<1x8x8xf32>
    %58 = vector.shape_cast %57 : vector<1x8x8xf32> to vector<8x8xf32>
    %59 = vector.extract_strided_slice %54 {offsets = [2, 0, 0], sizes = [1, 8, 8], strides = [1, 1, 1]} : vector<8x8x8xf32> to vector<1x8x8xf32>
    %60 = vector.shape_cast %59 : vector<1x8x8xf32> to vector<8x8xf32>
    %61 = vector.extract_strided_slice %54 {offsets = [3, 0, 0], sizes = [1, 8, 8], strides = [1, 1, 1]} : vector<8x8x8xf32> to vector<1x8x8xf32>
    %62 = vector.shape_cast %61 : vector<1x8x8xf32> to vector<8x8xf32>
    %63 = tpu.concatenate %56, %58, %60, %62 in 1 : vector<8x8xf32>, vector<8x8xf32>, vector<8x8xf32>, vector<8x8xf32> -> vector<8x32xf32>
    %64 = vector.extract_strided_slice %54 {offsets = [4, 0, 0], sizes = [1, 8, 8], strides = [1, 1, 1]} : vector<8x8x8xf32> to vector<1x8x8xf32>
    %65 = vector.shape_cast %64 : vector<1x8x8xf32> to vector<8x8xf32>
    %66 = vector.extract_strided_slice %54 {offsets = [5, 0, 0], sizes = [1, 8, 8], strides = [1, 1, 1]} : vector<8x8x8xf32> to vector<1x8x8xf32>
    %67 = vector.shape_cast %66 : vector<1x8x8xf32> to vector<8x8xf32>
    %68 = vector.extract_strided_slice %54 {offsets = [6, 0, 0], sizes = [1, 8, 8], strides = [1, 1, 1]} : vector<8x8x8xf32> to vector<1x8x8xf32>
    %69 = vector.shape_cast %68 : vector<1x8x8xf32> to vector<8x8xf32>
    %70 = vector.extract_strided_slice %54 {offsets = [7, 0, 0], sizes = [1, 8, 8], strides = [1, 1, 1]} : vector<8x8x8xf32> to vector<1x8x8xf32>
    %71 = vector.shape_cast %70 : vector<1x8x8xf32> to vector<8x8xf32>
    %72 = tpu.concatenate %65, %67, %69, %71 in 1 : vector<8x8xf32>, vector<8x8xf32>, vector<8x8xf32>, vector<8x8xf32> -> vector<8x32xf32>
    %73 = tpu.concatenate %63, %72 in 0 : vector<8x32xf32>, vector<8x32xf32> -> vector<16x32xf32>
    %74 = arith.truncf %73 : vector<16x32xf32> to vector<16x32xbf16>
    %c0_17 = arith.constant 0 : index
    %c0_18 = arith.constant 0 : index
    %c0_19 = arith.constant 0 : index
    %75 = vector.load %arg5[%c0_17, %c0_18, %c0_19] : memref<2x32x32xbf16, #tpu.memory_space<vmem>>, vector<1x32x32xbf16>
    %76 = vector.shape_cast %75 : vector<1x32x32xbf16> to vector<32x32xbf16>
    %cst_20 = arith.constant dense<0.000000e+00> : vector<16x32xf32>
    %77 = tpu.matmul %74, %76, %cst_20 {dimension_numbers = #tpu.dot_dimension_numbers<[1], [0], [0], [1], [0, 0, 1, 1], [], []>} : vector<16x32xbf16>, vector<32x32xbf16>, vector<16x32xf32> -> vector<16x32xf32>
    %78 = arith.addf %0, %77 : vector<16x32xf32>
    %79 = vector.broadcast %7 : vector<1x32xf32> to vector<16x32xf32>
    %80 = arith.addf %78, %79 : vector<16x32xf32>
    %cst_21 = arith.constant dense<0.000000e+00> : vector<16xf32>
    %81 = vector.multi_reduction <add>, %80, %cst_21 [1] : vector<16x32xf32> to vector<16xf32>
    %82 = vector.shape_cast %81 : vector<16xf32> to vector<16x1xf32>
    %cst_22 = arith.constant 3.200000e+01 : f32
    %83 = vector.broadcast %cst_22 : f32 to vector<16x1xf32>
    %84 = arith.divf %82, %83 : vector<16x1xf32>
    %85 = vector.broadcast %84 : vector<16x1xf32> to vector<16x32xf32>
    %86 = arith.subf %80, %85 : vector<16x32xf32>
    %87 = arith.mulf %86, %86 : vector<16x32xf32>
    %cst_23 = arith.constant dense<0.000000e+00> : vector<16xf32>
    %88 = vector.multi_reduction <add>, %87, %cst_23 [1] : vector<16x32xf32> to vector<16xf32>
    %89 = vector.shape_cast %88 : vector<16xf32> to vector<16x1xf32>
    %cst_24 = arith.constant 3.200000e+01 : f32
    %90 = vector.broadcast %cst_24 : f32 to vector<16x1xf32>
    %91 = arith.divf %89, %90 : vector<16x1xf32>
    %cst_25 = arith.constant 9.99999974E-6 : f32
    %92 = vector.broadcast %cst_25 : f32 to vector<16x1xf32>
    %93 = arith.addf %91, %92 : vector<16x1xf32>
    %94 = math.rsqrt %93 : vector<16x1xf32>
    %95 = vector.broadcast %94 : vector<16x1xf32> to vector<16x32xf32>
    %96 = arith.mulf %86, %95 : vector<16x32xf32>
    %97 = vector.broadcast %5 : vector<1x32xf32> to vector<16x32xf32>
    %98 = arith.mulf %96, %97 : vector<16x32xf32>
    %99 = vector.broadcast %6 : vector<1x32xf32> to vector<16x32xf32>
    %100 = arith.addf %98, %99 : vector<16x32xf32>
    %101 = arith.truncf %100 : vector<16x32xf32> to vector<16x32xbf16>
    %c0_26 = arith.constant 0 : index
    %c0_27 = arith.constant 0 : index
    %c0_28 = arith.constant 0 : index
    %102 = vector.load %arg6[%c0_26, %c0_27, %c0_28] : memref<2x32x64xbf16, #tpu.memory_space<vmem>>, vector<1x32x64xbf16>
    %103 = vector.shape_cast %102 : vector<1x32x64xbf16> to vector<32x64xbf16>
    %cst_29 = arith.constant dense<0.000000e+00> : vector<16x64xf32>
    %104 = tpu.matmul %101, %103, %cst_29 {dimension_numbers = #tpu.dot_dimension_numbers<[1], [0], [0], [1], [0, 0, 1, 1], [], []>} : vector<16x32xbf16>, vector<32x64xbf16>, vector<16x64xf32> -> vector<16x64xf32>
    %105 = vector.broadcast %9 : vector<1x64xf32> to vector<16x64xf32>
    %106 = arith.addf %104, %105 : vector<16x64xf32>
    %cst_30 = arith.constant 5.000000e-01 : f32
    %107 = vector.broadcast %cst_30 : f32 to vector<16x64xf32>
    %108 = arith.mulf %107, %106 : vector<16x64xf32>
    %cst_31 = arith.constant 0.707106769 : f32
    %109 = vector.broadcast %cst_31 : f32 to vector<16x64xf32>
    %110 = arith.mulf %106, %109 : vector<16x64xf32>
    %111 = math.erf %110 : vector<16x64xf32>
    %cst_32 = arith.constant 1.000000e+00 : f32
    %112 = vector.broadcast %cst_32 : f32 to vector<16x64xf32>
    %113 = arith.addf %112, %111 : vector<16x64xf32>
    %114 = arith.mulf %108, %113 : vector<16x64xf32>
    %115 = arith.truncf %114 : vector<16x64xf32> to vector<16x64xbf16>
    %c0_33 = arith.constant 0 : index
    %c0_34 = arith.constant 0 : index
    %c0_35 = arith.constant 0 : index
    %116 = vector.load %arg7[%c0_33, %c0_34, %c0_35] : memref<2x64x32xbf16, #tpu.memory_space<vmem>>, vector<1x64x32xbf16>
    %117 = vector.shape_cast %116 : vector<1x64x32xbf16> to vector<64x32xbf16>
    %cst_36 = arith.constant dense<0.000000e+00> : vector<16x32xf32>
    %118 = tpu.matmul %115, %117, %cst_36 {dimension_numbers = #tpu.dot_dimension_numbers<[1], [0], [0], [1], [0, 0, 1, 1], [], []>} : vector<16x64xbf16>, vector<64x32xbf16>, vector<16x32xf32> -> vector<16x32xf32>
    %119 = vector.broadcast %8 : vector<1x32xf32> to vector<16x32xf32>
    %120 = arith.addf %118, %119 : vector<16x32xf32>
    %121 = arith.addf %80, %120 : vector<16x32xf32>
    %c1 = arith.constant 1 : index
    %c0_37 = arith.constant 0 : index
    %c0_38 = arith.constant 0 : index
    %122 = vector.load %arg3[%c1, %c0_37, %c0_38] : memref<2x7x64xf32, #tpu.memory_space<vmem>>, vector<1x7x64xf32>
    %123 = vector.shape_cast %122 : vector<1x7x64xf32> to vector<7x64xf32>
    %124 = vector.extract_strided_slice %123 {offsets = [0, 0], sizes = [1, 32], strides = [1, 1]} : vector<7x64xf32> to vector<1x32xf32>
    %125 = vector.extract_strided_slice %123 {offsets = [1, 0], sizes = [1, 32], strides = [1, 1]} : vector<7x64xf32> to vector<1x32xf32>
    %126 = vector.extract_strided_slice %123 {offsets = [2, 0], sizes = [1, 32], strides = [1, 1]} : vector<7x64xf32> to vector<1x32xf32>
    %127 = vector.extract_strided_slice %123 {offsets = [3, 0], sizes = [1, 32], strides = [1, 1]} : vector<7x64xf32> to vector<1x32xf32>
    %128 = vector.extract_strided_slice %123 {offsets = [4, 0], sizes = [1, 32], strides = [1, 1]} : vector<7x64xf32> to vector<1x32xf32>
    %129 = vector.extract_strided_slice %123 {offsets = [5, 0], sizes = [1, 32], strides = [1, 1]} : vector<7x64xf32> to vector<1x32xf32>
    %130 = vector.extract_strided_slice %123 {offsets = [6, 0], sizes = [1, 64], strides = [1, 1]} : vector<7x64xf32> to vector<1x64xf32>
    %cst_39 = arith.constant dense<0.000000e+00> : vector<16xf32>
    %131 = vector.multi_reduction <add>, %121, %cst_39 [1] : vector<16x32xf32> to vector<16xf32>
    %132 = vector.shape_cast %131 : vector<16xf32> to vector<16x1xf32>
    %cst_40 = arith.constant 3.200000e+01 : f32
    %133 = vector.broadcast %cst_40 : f32 to vector<16x1xf32>
    %134 = arith.divf %132, %133 : vector<16x1xf32>
    %135 = vector.broadcast %134 : vector<16x1xf32> to vector<16x32xf32>
    %136 = arith.subf %121, %135 : vector<16x32xf32>
    %137 = arith.mulf %136, %136 : vector<16x32xf32>
    %cst_41 = arith.constant dense<0.000000e+00> : vector<16xf32>
    %138 = vector.multi_reduction <add>, %137, %cst_41 [1] : vector<16x32xf32> to vector<16xf32>
    %139 = vector.shape_cast %138 : vector<16xf32> to vector<16x1xf32>
    %cst_42 = arith.constant 3.200000e+01 : f32
    %140 = vector.broadcast %cst_42 : f32 to vector<16x1xf32>
    %141 = arith.divf %139, %140 : vector<16x1xf32>
    %cst_43 = arith.constant 9.99999974E-6 : f32
    %142 = vector.broadcast %cst_43 : f32 to vector<16x1xf32>
    %143 = arith.addf %141, %142 : vector<16x1xf32>
    %144 = math.rsqrt %143 : vector<16x1xf32>
    %145 = vector.broadcast %144 : vector<16x1xf32> to vector<16x32xf32>
    %146 = arith.mulf %136, %145 : vector<16x32xf32>
    %147 = vector.broadcast %124 : vector<1x32xf32> to vector<16x32xf32>
    %148 = arith.mulf %146, %147 : vector<16x32xf32>
    %149 = vector.broadcast %125 : vector<1x32xf32> to vector<16x32xf32>
    %150 = arith.addf %148, %149 : vector<16x32xf32>
    %151 = arith.truncf %150 : vector<16x32xf32> to vector<16x32xbf16>
    %152 = vector.shape_cast %151 : vector<16x32xbf16> to vector<1x16x32xbf16>
    %153 = vector.shape_cast %152 : vector<1x16x32xbf16> to vector<1x16x32xbf16>
    %154 = vector.broadcast %153 : vector<1x16x32xbf16> to vector<4x16x32xbf16>
    %c1_44 = arith.constant 1 : index
    %c0_45 = arith.constant 0 : index
    %c0_46 = arith.constant 0 : index
    %c0_47 = arith.constant 0 : index
    %155 = vector.load %arg4[%c1_44, %c0_45, %c0_46, %c0_47] : memref<2x4x32x24xbf16, #tpu.memory_space<vmem>>, vector<1x4x32x24xbf16>
    %156 = vector.shape_cast %155 : vector<1x4x32x24xbf16> to vector<4x32x24xbf16>
    "tpu.trace_start"() <{level = 10 : i32, message = "hmd,hde->hme"}> : () -> ()
    %cst_48 = arith.constant dense<0.000000e+00> : vector<4x16x24xf32>
    %157 = tpu.matmul %154, %156, %cst_48 {dimension_numbers = #tpu.dot_dimension_numbers<[2], [1], [1], [2], [0, 0, 0, 1, 1, 2], [0], [0]>} : vector<4x16x32xbf16>, vector<4x32x24xbf16>, vector<4x16x24xf32> -> vector<4x16x24xf32>
    "tpu.trace_stop"() : () -> ()
    %158 = vector.extract_strided_slice %157 {offsets = [0, 0, 0], sizes = [4, 8, 24], strides = [1, 1, 1]} : vector<4x16x24xf32> to vector<4x8x24xf32>
    %159 = vector.extract_strided_slice %157 {offsets = [0, 8, 0], sizes = [4, 8, 24], strides = [1, 1, 1]} : vector<4x16x24xf32> to vector<4x8x24xf32>
    %160 = tpu.concatenate %158, %159 in 0 : vector<4x8x24xf32>, vector<4x8x24xf32> -> vector<8x8x24xf32>
    %161 = vector.extract_strided_slice %160 {offsets = [0, 0, 0], sizes = [8, 8, 8], strides = [1, 1, 1]} : vector<8x8x24xf32> to vector<8x8x8xf32>
    %162 = vector.extract_strided_slice %160 {offsets = [0, 0, 8], sizes = [8, 8, 8], strides = [1, 1, 1]} : vector<8x8x24xf32> to vector<8x8x8xf32>
    %163 = vector.extract_strided_slice %160 {offsets = [0, 0, 16], sizes = [8, 8, 8], strides = [1, 1, 1]} : vector<8x8x24xf32> to vector<8x8x8xf32>
    "tpu.trace_start"() <{level = 10 : i32, message = "gid,gjd->gij"}> : () -> ()
    %cst_49 = arith.constant dense<0.000000e+00> : vector<8x8x8xf32>
    %164 = tpu.matmul %161, %162, %cst_49 {dimension_numbers = #tpu.dot_dimension_numbers<[2], [2], [1], [1], [0, 0, 0, 1, 1, 1], [0], [0]>} : vector<8x8x8xf32>, vector<8x8x8xf32>, vector<8x8x8xf32> -> vector<8x8x8xf32>
    "tpu.trace_stop"() : () -> ()
    %cst_50 = arith.constant dense<0xFF800000> : vector<8x8xf32>
    %165 = vector.multi_reduction <maximumf>, %164, %cst_50 [2] : vector<8x8x8xf32> to vector<8x8xf32>
    %166 = vector.shape_cast %165 : vector<8x8xf32> to vector<8x8x1xf32>
    %167 = vector.broadcast %166 : vector<8x8x1xf32> to vector<8x8x8xf32>
    %168 = arith.subf %164, %167 : vector<8x8x8xf32>
    %169 = math.exp %168 : vector<8x8x8xf32>
    %cst_51 = arith.constant dense<0.000000e+00> : vector<8x8xf32>
    %170 = vector.multi_reduction <add>, %169, %cst_51 [2] : vector<8x8x8xf32> to vector<8x8xf32>
    %171 = vector.shape_cast %170 : vector<8x8xf32> to vector<8x8x1xf32>
    %172 = tpu.reciprocal %171 {approx = true} : vector<8x8x1xf32> -> vector<8x8x1xf32>
    %173 = vector.broadcast %172 : vector<8x8x1xf32> to vector<8x8x8xf32>
    %174 = arith.mulf %169, %173 : vector<8x8x8xf32>
    "tpu.trace_start"() <{level = 10 : i32, message = "gij,gjd->gid"}> : () -> ()
    %cst_52 = arith.constant dense<0.000000e+00> : vector<8x8x8xf32>
    %175 = tpu.matmul %174, %163, %cst_52 {dimension_numbers = #tpu.dot_dimension_numbers<[2], [1], [1], [2], [0, 0, 0, 1, 1, 2], [0], [0]>} : vector<8x8x8xf32>, vector<8x8x8xf32>, vector<8x8x8xf32> -> vector<8x8x8xf32>
    "tpu.trace_stop"() : () -> ()
    %176 = vector.extract_strided_slice %175 {offsets = [0, 0, 0], sizes = [1, 8, 8], strides = [1, 1, 1]} : vector<8x8x8xf32> to vector<1x8x8xf32>
    %177 = vector.shape_cast %176 : vector<1x8x8xf32> to vector<8x8xf32>
    %178 = vector.extract_strided_slice %175 {offsets = [1, 0, 0], sizes = [1, 8, 8], strides = [1, 1, 1]} : vector<8x8x8xf32> to vector<1x8x8xf32>
    %179 = vector.shape_cast %178 : vector<1x8x8xf32> to vector<8x8xf32>
    %180 = vector.extract_strided_slice %175 {offsets = [2, 0, 0], sizes = [1, 8, 8], strides = [1, 1, 1]} : vector<8x8x8xf32> to vector<1x8x8xf32>
    %181 = vector.shape_cast %180 : vector<1x8x8xf32> to vector<8x8xf32>
    %182 = vector.extract_strided_slice %175 {offsets = [3, 0, 0], sizes = [1, 8, 8], strides = [1, 1, 1]} : vector<8x8x8xf32> to vector<1x8x8xf32>
    %183 = vector.shape_cast %182 : vector<1x8x8xf32> to vector<8x8xf32>
    %184 = tpu.concatenate %177, %179, %181, %183 in 1 : vector<8x8xf32>, vector<8x8xf32>, vector<8x8xf32>, vector<8x8xf32> -> vector<8x32xf32>
    %185 = vector.extract_strided_slice %175 {offsets = [4, 0, 0], sizes = [1, 8, 8], strides = [1, 1, 1]} : vector<8x8x8xf32> to vector<1x8x8xf32>
    %186 = vector.shape_cast %185 : vector<1x8x8xf32> to vector<8x8xf32>
    %187 = vector.extract_strided_slice %175 {offsets = [5, 0, 0], sizes = [1, 8, 8], strides = [1, 1, 1]} : vector<8x8x8xf32> to vector<1x8x8xf32>
    %188 = vector.shape_cast %187 : vector<1x8x8xf32> to vector<8x8xf32>
    %189 = vector.extract_strided_slice %175 {offsets = [6, 0, 0], sizes = [1, 8, 8], strides = [1, 1, 1]} : vector<8x8x8xf32> to vector<1x8x8xf32>
    %190 = vector.shape_cast %189 : vector<1x8x8xf32> to vector<8x8xf32>
    %191 = vector.extract_strided_slice %175 {offsets = [7, 0, 0], sizes = [1, 8, 8], strides = [1, 1, 1]} : vector<8x8x8xf32> to vector<1x8x8xf32>
    %192 = vector.shape_cast %191 : vector<1x8x8xf32> to vector<8x8xf32>
    %193 = tpu.concatenate %186, %188, %190, %192 in 1 : vector<8x8xf32>, vector<8x8xf32>, vector<8x8xf32>, vector<8x8xf32> -> vector<8x32xf32>
    %194 = tpu.concatenate %184, %193 in 0 : vector<8x32xf32>, vector<8x32xf32> -> vector<16x32xf32>
    %195 = arith.truncf %194 : vector<16x32xf32> to vector<16x32xbf16>
    %c1_53 = arith.constant 1 : index
    %c0_54 = arith.constant 0 : index
    %c0_55 = arith.constant 0 : index
    %196 = vector.load %arg5[%c1_53, %c0_54, %c0_55] : memref<2x32x32xbf16, #tpu.memory_space<vmem>>, vector<1x32x32xbf16>
    %197 = vector.shape_cast %196 : vector<1x32x32xbf16> to vector<32x32xbf16>
    %cst_56 = arith.constant dense<0.000000e+00> : vector<16x32xf32>
    %198 = tpu.matmul %195, %197, %cst_56 {dimension_numbers = #tpu.dot_dimension_numbers<[1], [0], [0], [1], [0, 0, 1, 1], [], []>} : vector<16x32xbf16>, vector<32x32xbf16>, vector<16x32xf32> -> vector<16x32xf32>
    %199 = arith.addf %121, %198 : vector<16x32xf32>
    %200 = vector.broadcast %128 : vector<1x32xf32> to vector<16x32xf32>
    %201 = arith.addf %199, %200 : vector<16x32xf32>
    %cst_57 = arith.constant dense<0.000000e+00> : vector<16xf32>
    %202 = vector.multi_reduction <add>, %201, %cst_57 [1] : vector<16x32xf32> to vector<16xf32>
    %203 = vector.shape_cast %202 : vector<16xf32> to vector<16x1xf32>
    %cst_58 = arith.constant 3.200000e+01 : f32
    %204 = vector.broadcast %cst_58 : f32 to vector<16x1xf32>
    %205 = arith.divf %203, %204 : vector<16x1xf32>
    %206 = vector.broadcast %205 : vector<16x1xf32> to vector<16x32xf32>
    %207 = arith.subf %201, %206 : vector<16x32xf32>
    %208 = arith.mulf %207, %207 : vector<16x32xf32>
    %cst_59 = arith.constant dense<0.000000e+00> : vector<16xf32>
    %209 = vector.multi_reduction <add>, %208, %cst_59 [1] : vector<16x32xf32> to vector<16xf32>
    %210 = vector.shape_cast %209 : vector<16xf32> to vector<16x1xf32>
    %cst_60 = arith.constant 3.200000e+01 : f32
    %211 = vector.broadcast %cst_60 : f32 to vector<16x1xf32>
    %212 = arith.divf %210, %211 : vector<16x1xf32>
    %cst_61 = arith.constant 9.99999974E-6 : f32
    %213 = vector.broadcast %cst_61 : f32 to vector<16x1xf32>
    %214 = arith.addf %212, %213 : vector<16x1xf32>
    %215 = math.rsqrt %214 : vector<16x1xf32>
    %216 = vector.broadcast %215 : vector<16x1xf32> to vector<16x32xf32>
    %217 = arith.mulf %207, %216 : vector<16x32xf32>
    %218 = vector.broadcast %126 : vector<1x32xf32> to vector<16x32xf32>
    %219 = arith.mulf %217, %218 : vector<16x32xf32>
    %220 = vector.broadcast %127 : vector<1x32xf32> to vector<16x32xf32>
    %221 = arith.addf %219, %220 : vector<16x32xf32>
    %222 = arith.truncf %221 : vector<16x32xf32> to vector<16x32xbf16>
    %c1_62 = arith.constant 1 : index
    %c0_63 = arith.constant 0 : index
    %c0_64 = arith.constant 0 : index
    %223 = vector.load %arg6[%c1_62, %c0_63, %c0_64] : memref<2x32x64xbf16, #tpu.memory_space<vmem>>, vector<1x32x64xbf16>
    %224 = vector.shape_cast %223 : vector<1x32x64xbf16> to vector<32x64xbf16>
    %cst_65 = arith.constant dense<0.000000e+00> : vector<16x64xf32>
    %225 = tpu.matmul %222, %224, %cst_65 {dimension_numbers = #tpu.dot_dimension_numbers<[1], [0], [0], [1], [0, 0, 1, 1], [], []>} : vector<16x32xbf16>, vector<32x64xbf16>, vector<16x64xf32> -> vector<16x64xf32>
    %226 = vector.broadcast %130 : vector<1x64xf32> to vector<16x64xf32>
    %227 = arith.addf %225, %226 : vector<16x64xf32>
    %cst_66 = arith.constant 5.000000e-01 : f32
    %228 = vector.broadcast %cst_66 : f32 to vector<16x64xf32>
    %229 = arith.mulf %228, %227 : vector<16x64xf32>
    %cst_67 = arith.constant 0.707106769 : f32
    %230 = vector.broadcast %cst_67 : f32 to vector<16x64xf32>
    %231 = arith.mulf %227, %230 : vector<16x64xf32>
    %232 = math.erf %231 : vector<16x64xf32>
    %cst_68 = arith.constant 1.000000e+00 : f32
    %233 = vector.broadcast %cst_68 : f32 to vector<16x64xf32>
    %234 = arith.addf %233, %232 : vector<16x64xf32>
    %235 = arith.mulf %229, %234 : vector<16x64xf32>
    %236 = arith.truncf %235 : vector<16x64xf32> to vector<16x64xbf16>
    %c1_69 = arith.constant 1 : index
    %c0_70 = arith.constant 0 : index
    %c0_71 = arith.constant 0 : index
    %237 = vector.load %arg7[%c1_69, %c0_70, %c0_71] : memref<2x64x32xbf16, #tpu.memory_space<vmem>>, vector<1x64x32xbf16>
    %238 = vector.shape_cast %237 : vector<1x64x32xbf16> to vector<64x32xbf16>
    %cst_72 = arith.constant dense<0.000000e+00> : vector<16x32xf32>
    %239 = tpu.matmul %236, %238, %cst_72 {dimension_numbers = #tpu.dot_dimension_numbers<[1], [0], [0], [1], [0, 0, 1, 1], [], []>} : vector<16x64xbf16>, vector<64x32xbf16>, vector<16x32xf32> -> vector<16x32xf32>
    %240 = vector.broadcast %129 : vector<1x32xf32> to vector<16x32xf32>
    %241 = arith.addf %239, %240 : vector<16x32xf32>
    %242 = arith.addf %201, %241 : vector<16x32xf32>
    %c0_73 = arith.constant 0 : index
    %c0_74 = arith.constant 0 : index
    %243 = vector.load %arg9[%c0_73, %c0_74] : memref<4x32xf32, #tpu.memory_space<vmem>>, vector<4x32xf32>
    %244 = arith.truncf %242 : vector<16x32xf32> to vector<16x32xbf16>
    %c0_75 = arith.constant 0 : index
    %c0_76 = arith.constant 0 : index
    %c0_77 = arith.constant 0 : index
    %245 = vector.load %arg8[%c0_75, %c0_76, %c0_77] : memref<4x32x32xbf16, #tpu.memory_space<vmem>>, vector<1x32x32xbf16>
    %246 = vector.shape_cast %245 : vector<1x32x32xbf16> to vector<32x32xbf16>
    %cst_78 = arith.constant dense<0.000000e+00> : vector<16x32xf32>
    %247 = tpu.matmul %244, %246, %cst_78 {dimension_numbers = #tpu.dot_dimension_numbers<[1], [0], [0], [1], [0, 0, 1, 1], [], []>} : vector<16x32xbf16>, vector<32x32xbf16>, vector<16x32xf32> -> vector<16x32xf32>
    %248 = vector.extract_strided_slice %243 {offsets = [0, 0], sizes = [1, 32], strides = [1, 1]} : vector<4x32xf32> to vector<1x32xf32>
    %249 = vector.broadcast %248 : vector<1x32xf32> to vector<16x32xf32>
    %250 = arith.addf %247, %249 : vector<16x32xf32>
    %cst_79 = arith.constant 0.000000e+00 : f32
    %251 = vector.broadcast %cst_79 : f32 to vector<16x32xf32>
    %252 = arith.maximumf %250, %251 : vector<16x32xf32>
    %253 = arith.truncf %252 : vector<16x32xf32> to vector<16x32xbf16>
    %c1_80 = arith.constant 1 : index
    %c0_81 = arith.constant 0 : index
    %c0_82 = arith.constant 0 : index
    %254 = vector.load %arg8[%c1_80, %c0_81, %c0_82] : memref<4x32x32xbf16, #tpu.memory_space<vmem>>, vector<1x32x32xbf16>
    %255 = vector.shape_cast %254 : vector<1x32x32xbf16> to vector<32x32xbf16>
    %cst_83 = arith.constant dense<0.000000e+00> : vector<16x32xf32>
    %256 = tpu.matmul %253, %255, %cst_83 {dimension_numbers = #tpu.dot_dimension_numbers<[1], [0], [0], [1], [0, 0, 1, 1], [], []>} : vector<16x32xbf16>, vector<32x32xbf16>, vector<16x32xf32> -> vector<16x32xf32>
    %257 = vector.extract_strided_slice %243 {offsets = [1, 0], sizes = [1, 32], strides = [1, 1]} : vector<4x32xf32> to vector<1x32xf32>
    %258 = vector.broadcast %257 : vector<1x32xf32> to vector<16x32xf32>
    %259 = arith.addf %256, %258 : vector<16x32xf32>
    %c2 = arith.constant 2 : index
    %c0_84 = arith.constant 0 : index
    %c0_85 = arith.constant 0 : index
    %260 = vector.load %arg8[%c2, %c0_84, %c0_85] : memref<4x32x32xbf16, #tpu.memory_space<vmem>>, vector<1x32x32xbf16>
    %261 = vector.shape_cast %260 : vector<1x32x32xbf16> to vector<32x32xbf16>
    %cst_86 = arith.constant dense<0.000000e+00> : vector<16x32xf32>
    %262 = tpu.matmul %253, %261, %cst_86 {dimension_numbers = #tpu.dot_dimension_numbers<[1], [0], [0], [1], [0, 0, 1, 1], [], []>} : vector<16x32xbf16>, vector<32x32xbf16>, vector<16x32xf32> -> vector<16x32xf32>
    %263 = vector.extract_strided_slice %243 {offsets = [2, 0], sizes = [1, 32], strides = [1, 1]} : vector<4x32xf32> to vector<1x32xf32>
    %264 = vector.broadcast %263 : vector<1x32xf32> to vector<16x32xf32>
    %265 = arith.addf %262, %264 : vector<16x32xf32>
    %cst_87 = arith.constant 0.000000e+00 : f32
    %266 = vector.broadcast %cst_87 : f32 to vector<16x32xf32>
    %267 = arith.maximumf %265, %266 : vector<16x32xf32>
    %268 = vector.broadcast %cst_87 : f32 to vector<16x32xf32>
    %269 = arith.subf %265, %268 : vector<16x32xf32>
    %270 = arith.cmpf one, %269, %269 : vector<16x32xf32>
    %271 = vector.broadcast %cst_87 : f32 to vector<16x32xf32>
    %272 = arith.addf %265, %271 : vector<16x32xf32>
    %273 = math.absf %269 : vector<16x32xf32>
    %cst_88 = arith.constant 0.000000e+00 : f32
    %274 = vector.broadcast %cst_88 : f32 to vector<16x32xf32>
    %275 = arith.subf %274, %273 : vector<16x32xf32>
    %276 = math.exp %275 : vector<16x32xf32>
    %277 = math.log1p %276 : vector<16x32xf32>
    %278 = arith.addf %267, %277 : vector<16x32xf32>
    %279 = arith.select %270, %272, %278 : vector<16x32xi1>, vector<16x32xf32>
    %c0_89 = arith.constant 0 : index
    %c0_90 = arith.constant 0 : index
    %280 = vector.load %arg2[%c0_89, %c0_90] : memref<16x32xf32, #tpu.memory_space<vmem>>, vector<16x32xf32>
    %281 = arith.mulf %280, %279 : vector<16x32xf32>
    %282 = arith.addf %259, %281 : vector<16x32xf32>
    %283 = arith.truncf %282 : vector<16x32xf32> to vector<16x32xbf16>
    %c3 = arith.constant 3 : index
    %c0_91 = arith.constant 0 : index
    %c0_92 = arith.constant 0 : index
    %284 = vector.load %arg8[%c3, %c0_91, %c0_92] : memref<4x32x32xbf16, #tpu.memory_space<vmem>>, vector<1x32x32xbf16>
    %285 = vector.shape_cast %284 : vector<1x32x32xbf16> to vector<32x32xbf16>
    %cst_93 = arith.constant dense<0.000000e+00> : vector<16x32xf32>
    %286 = tpu.matmul %283, %285, %cst_93 {dimension_numbers = #tpu.dot_dimension_numbers<[1], [0], [0], [1], [0, 0, 1, 1], [], []>} : vector<16x32xbf16>, vector<32x32xbf16>, vector<16x32xf32> -> vector<16x32xf32>
    %287 = vector.extract_strided_slice %243 {offsets = [3, 0], sizes = [1, 32], strides = [1, 1]} : vector<4x32xf32> to vector<1x32xf32>
    %288 = vector.broadcast %287 : vector<1x32xf32> to vector<16x32xf32>
    %289 = arith.addf %286, %288 : vector<16x32xf32>
    %290 = tpu.concatenate %282, %289, %259, %279 in 1 : vector<16x32xf32>, vector<16x32xf32>, vector<16x32xf32>, vector<16x32xf32> -> vector<16x128xf32>
    %c0_94 = arith.constant 0 : index
    %c0_95 = arith.constant 0 : index
    %291 = vector.load %arg10[%c0_94, %c0_95] : memref<16x128xf32, #tpu.memory_space<vmem>>, vector<16x128xf32>
    tpu.vector_store %arg10[%c0_94, %c0_95], %290 {strides = array<i32>} : memref<16x128xf32, #tpu.memory_space<vmem>>, vector<16x128xf32>,
    return
  }
  func.func @transform_0(%arg0: i32) -> (i32, i32) {
    %c0_i32 = arith.constant 0 : i32
    %c0_i32_0 = arith.constant 0 : i32
    %c0_i32_1 = arith.constant 0 : i32
    return %c0_i32, %c0_i32_0 : i32, i32
  }
  func.func @transform_1(%arg0: i32) -> (i32, i32) {
    %c0_i32 = arith.constant 0 : i32
    %c0_i32_0 = arith.constant 0 : i32
    %c0_i32_1 = arith.constant 0 : i32
    return %c0_i32, %c0_i32_0 : i32, i32
  }
  func.func @transform_2(%arg0: i32) -> (i32, i32, i32) {
    %c0_i32 = arith.constant 0 : i32
    %c0_i32_0 = arith.constant 0 : i32
    %c0_i32_1 = arith.constant 0 : i32
    %c0_i32_2 = arith.constant 0 : i32
    return %c0_i32, %c0_i32_0, %c0_i32_1 : i32, i32, i32
  }
  func.func @transform_3(%arg0: i32) -> (i32, i32, i32, i32) {
    %c0_i32 = arith.constant 0 : i32
    %c0_i32_0 = arith.constant 0 : i32
    %c0_i32_1 = arith.constant 0 : i32
    %c0_i32_2 = arith.constant 0 : i32
    %c0_i32_3 = arith.constant 0 : i32
    return %c0_i32, %c0_i32_0, %c0_i32_1, %c0_i32_2 : i32, i32, i32, i32
  }
  func.func @transform_4(%arg0: i32) -> (i32, i32, i32) {
    %c0_i32 = arith.constant 0 : i32
    %c0_i32_0 = arith.constant 0 : i32
    %c0_i32_1 = arith.constant 0 : i32
    %c0_i32_2 = arith.constant 0 : i32
    return %c0_i32, %c0_i32_0, %c0_i32_1 : i32, i32, i32
  }
  func.func @transform_5(%arg0: i32) -> (i32, i32, i32) {
    %c0_i32 = arith.constant 0 : i32
    %c0_i32_0 = arith.constant 0 : i32
    %c0_i32_1 = arith.constant 0 : i32
    %c0_i32_2 = arith.constant 0 : i32
    return %c0_i32, %c0_i32_0, %c0_i32_1 : i32, i32, i32
  }
  func.func @transform_6(%arg0: i32) -> (i32, i32, i32) {
    %c0_i32 = arith.constant 0 : i32
    %c0_i32_0 = arith.constant 0 : i32
    %c0_i32_1 = arith.constant 0 : i32
    %c0_i32_2 = arith.constant 0 : i32
    return %c0_i32, %c0_i32_0, %c0_i32_1 : i32, i32, i32
  }
  func.func @transform_7(%arg0: i32) -> (i32, i32, i32) {
    %c0_i32 = arith.constant 0 : i32
    %c0_i32_0 = arith.constant 0 : i32
    %c0_i32_1 = arith.constant 0 : i32
    %c0_i32_2 = arith.constant 0 : i32
    return %c0_i32, %c0_i32_0, %c0_i32_1 : i32, i32, i32
  }
  func.func @transform_8(%arg0: i32) -> (i32, i32) {
    %c0_i32 = arith.constant 0 : i32
    %c0_i32_0 = arith.constant 0 : i32
    %c0_i32_1 = arith.constant 0 : i32
    return %c0_i32, %c0_i32_0 : i32, i32
  }
  func.func @transform_9(%arg0: i32) -> (i32, i32) {
    %c0_i32 = arith.constant 0 : i32
    %c0_i32_0 = arith.constant 0 : i32
    %c0_i32_1 = arith.constant 0 : i32
    return %c0_i32, %c0_i32_0 : i32, i32
  }
}

</mosaic_0001>

<bundles_post_ra>
// kernel: transformer_ib_forward.1
= control target key start
LH: loop header
LB: loop body
LE: loop exit
PB: predicated region body
PF: predicated region fallthrough
CT: control target
= control target key end

     0   :  { %vm36_vm0 = vcmask 261120   ;;  %v4904_v14 = vmov 0.0   ;;  %vm4905_vm1 = vmmov 0   ;;  %v64_v25 = vlaneseq  ;;  %s4906_s30 = smov 120   ;;  %s4907_s10 = smov 112   ;;  %s5652_s0 = inlined_call_operand.vmem [shape: f32[16,32], index: 0, kind: input, shape index: {}]   ;;  %s5653_s3 = inlined_call_operand.vmem [shape: bf16[2,4,32,24], index: 3, kind: input, shape index: {}]   ;;  %s5654_s2 = inlined_call_operand.vmem [shape: f32[2,7,64], index: 2, kind: input, shape index: {}]   ;;  %s5655_s4 = inlined_call_operand.vmem [shape: bf16[2,32,32], index: 4, kind: input, shape index: {}]   ;;  %s5656_s5 = inlined_call_operand.vmem [shape: bf16[2,32,64], index: 5, kind: input, shape index: {}]   ;;  %s5657_s6 = inlined_call_operand.vmem [shape: bf16[2,64,32], index: 6, kind: input, shape index: {}]   ;;  %s5658_s7 = inlined_call_operand.vmem [shape: bf16[4,32,32], index: 7, kind: input, shape index: {}]   ;;  %s5659_s8 = inlined_call_operand.vmem [shape: f32[4,32], index: 8, kind: input, shape index: {}]   ;;  %s5660_s1 = inlined_call_operand.vmem [shape: f32[16,32], index: 1, kind: input, shape index: {}]   ;;  %s5661_s9 = inlined_call_operand.vmem [shape: f32[16,128], index: 9, kind: output, shape index: {}]  }
   0x1   :  { %v4967_v0 = vld [vmem:[%s5652_s0] sm:$0xff]  ;;  %v4972_v1 = vld [vmem:[%s5652_s0 + $0x8] sm:$0xff]  ;;  %4416 = vmatprep.subr.bf16.mxu0 %v4904_v14  ;;  %4424 = vmatprep.subr.bf16.mxu1 %v4904_v14  ;;  %v4769_v16 = vld [vmem:[%s5653_s3 + $0x18] sm:$0xff]   ;;  %vm311_vm2 = vcmask 64512   ;;  %s4908_s14 = smov 8   ;;  %s4909_s15 = smov 24  }
   0x2   :  { %v37_v2 = vsel %vm36_vm0, %v4967_v0, 0.0  ;;  %v40_v3 = vsel %vm36_vm0, %v4972_v1, 0.0  ;;  %v4768_v15 = vld [vmem:[%s5653_s3 + $0x8] sm:$0xff]   ;;  %4420 = vmatprep.mubr.msk.bf16.mxu0 %vm4905_vm1, %v4904_v14  ;;  %4428 = vmatprep.mubr.msk.bf16.mxu1 %vm4905_vm1, %v4904_v14  ;;  %v4770_v17 = vld [vmem:[%s5653_s3] sm:$0xff]   ;;  %v4771_v18 = vld [vmem:[%s5653_s3 + $0x10] sm:$0xff]   ;;  %v5004_v26 = vshrl.u32 %v64_v25, 7 }
   0x3   :  { %38 = vadd.xlane.f32.xlu0 %v37_v2  ;;  %4417 = vmatpush3.bf16.msra.mxu0 %v4768_v15  ;;  %v5012_v28 = vld [vmem:[%s5654_s2] sm:$0x7f]  ;;  %v4772_v40 = vld [vmem:[%s5653_s3 + $0x28] sm:$0xff]   ;;  %v4773_v41 = vld [vmem:[%s5653_s3 + $0x38] sm:$0xff]   ;;  %s4910_s16 = smov 16   ;;  %vm1634_vm3 = vcmask 130048  }
   0x4   :  { %4425 = vmatpush3.bf16.msra.mxu1 %v4769_v16  ;;  %4418 = vmatprep.subr.bf16.mxu0 %v4904_v14  ;;  %v5007_v27 = vsub.s32 0, %v5004_v26  ;;  %v5017_v32 = vsub.s32 1, %v5004_v26  ;;  %v4774_v43 = vld [vmem:[%s5653_s3 + $0x20] sm:$0xff]   ;;  %v4775_v44 = vld [vmem:[%s5653_s3 + $0x30] sm:$0xff]   ;;  %vm1636_vm4 = vcmask 195584   ;;  %vm1872_vm5 = vcmask 523264  }
   0x5   :  { %4426 = vmatprep.subr.bf16.mxu1 %v4904_v14  ;;  %s4912_s12 = smov 32   ;;  %vm4134_vm10 = vcmask 785408  }
   0x6   :  { %v67_v31 = vrot.slane %v5012_v28, %v5007_v27  ;;  %v73_v36 = vrot.slane %v5012_v28, %v5017_v32 }
   0x7   :  { %41 = vadd.xlane.f32.xlu0 %v40_v3  ;;  %4419 = vmatpush3.bf16.msra.mxu0 %v4770_v17 }
   0x8   :  { %4427 = vmatpush3.bf16.msra.mxu1 %v4771_v18  ;;  %4432 = vmatprep.subr.bf16.mxu0 %v4904_v14 }
   0x9   :  { %4440 = vmatprep.subr.bf16.mxu1 %v4904_v14 }
  0x8c   :  { %v39_v4 = vpop.xlane.xlu0 %38 }
  0x8d   :  { %v44_v5 = vmul.f32 0.03125, %v39_v4 }
  0x8f   :  { %v46_v6 = vsub.f32 %v4967_v0, %v44_v5 }
  0x90   :  { %v42_v7 = vpop.xlane.xlu0 %41 }
  0x91   :  { %v45_v8 = vmul.f32 0.03125, %v42_v7  ;;  %v48_v9 = vmul.f32 %v46_v6, %v46_v6 }
  0x93   :  { %v47_v10 = vsub.f32 %v4972_v1, %v45_v8  ;;  %v50_v11 = vsel %vm36_vm0, %v48_v9, 0.0 }
  0x94   :  { %51 = vadd.xlane.f32.xlu1 %v50_v11 }
  0x95   :  { %v49_v12 = vmul.f32 %v47_v10, %v47_v10 }
  0x97   :  { %v53_v13 = vsel %vm36_vm0, %v49_v12, 0.0 }
  0x98   :  { %54 = vadd.xlane.f32.xlu1 %v53_v13 }
 0x11d   :  { %v52_v19 = vpop.xlane.xlu1 %51 }
 0x11e   :  { %v56_v20 = vmul.f32 0.03125, %v52_v19 }
 0x120   :  { %v58_v21 = vadd.f32 1e-05, %v56_v20 }
 0x121   :  { %v55_v22 = vpop.xlane.xlu1 %54 }
 0x122   :  { %4808 = vrsqrt.f32 %v58_v21  ;;  %v57_v23 = vmul.f32 0.03125, %v55_v22 }
 0x124   :  { %v59_v24 = vadd.f32 1e-05, %v57_v23 }
 0x126   :  { %4810 = vrsqrt.f32 %v59_v24 }
 0x12f   :  { %v4809_v29 = vpop.eup %4808 }
 0x130   :  { %v62_v30 = vmul.f32 %v4809_v29, %v46_v6 }
 0x132   :  { %v68_v35 = vmul.f32 %v67_v31, %v62_v30 }
 0x133   :  { %v4811_v33 = vpop.eup %4810 }
 0x134   :  { %v63_v34 = vmul.f32 %v4811_v33, %v47_v10  ;;  %v74_v38 = vadd.f32 %v73_v36, %v68_v35 }
 0x136   :  { %v69_v37 = vmul.f32 %v67_v31, %v63_v34 }
 0x138   :  { %v75_v39 = vadd.f32 %v73_v36, %v69_v37 }
 0x13a   :  { %v76_v42 = vpack.c.bf16 %v75_v39, %v74_v38 }
 0x13c   :  { %4421 = vmatmul.mubr.msk.bf16.vlgmr.msra.gmra.mxu0 %vm36_vm0, %v76_v42  ;;  %4429 = vmatmul.mubr.msk.bf16.vlgmr.msra.gmra.mxu1 %vm36_vm0, %v76_v42 }
 0x13d   :  { %4433 = vmatpush3.bf16.msra.mxu0 %v4772_v40  ;;  %4441 = vmatpush3.bf16.msra.mxu1 %v4773_v41 }
 0x13e   :  { %4434 = vmatprep.subr.bf16.mxu0 %v4904_v14  ;;  %4442 = vmatprep.subr.bf16.mxu1 %v4904_v14 }
 0x13f   :  { %4436 = vmatprep.mubr.msk.bf16.mxu0 %vm4905_vm1, %v4904_v14  ;;  %4444 = vmatprep.mubr.msk.bf16.mxu1 %vm4905_vm1, %v4904_v14 }
 0x141   :  { %4435 = vmatpush3.bf16.msra.mxu0 %v4774_v43  ;;  %4443 = vmatpush3.bf16.msra.mxu1 %v4775_v44 }
 0x142   :  { %4453 = vmatprep.subr.mxu1 %v4904_v14  ;;  %4448 = vmatprep.subr.mxu0 %v4904_v14 }
 0x144   :  { %4437 = vmatmul.mubr.msk.bf16.vlgmr.msra.gmra.mxu0 %vm36_vm0, %v76_v42  ;;  %4445 = vmatmul.mubr.msk.bf16.vlgmr.msra.gmra.mxu1 %vm36_vm0, %v76_v42 }
 0x145   :  { %4450 = vmatprep.mubr.msk.f32.mxu0 %vm4905_vm1, %v4904_v14  ;;  %4455 = vmatprep.mubr.msk.f32.mxu1 %vm4905_vm1, %v4904_v14 }
 0x1fc   :  { %v5049_v45 = vpop.f32.mrf.mxu0  ;;  %v5051_v46 = vpop.f32.mrf.mxu1 }
 0x1fd   :  { %387 = vrot.lane.b32.xlu1 %v5051_v46, %s4906_s30  ;;  %309 = vrot.lane.b32.xlu0 %v5049_v45, %s4906_s30 }
 0x1fe   :  { %v4422_v47 = vpop.f32.mrf.mxu0  ;;  %v4430_v48 = vpop.f32.mrf.mxu1 }
 0x200   :  { %v5057_v49 = vpop.f32.mrf.mxu0  ;;  %v5059_v50 = vpop.f32.mrf.mxu1 }
 0x201   :  { %618 = vrot.lane.b32.xlu0 %v5057_v49, %s4906_s30 }
 0x202   :  { %v4423_v51 = vpop.f32.mrf.mxu0  ;;  %v4431_v52 = vpop.f32.mrf.mxu1 }
 0x204   :  { %v5063_v53 = vpop.f32.mrf.mxu0  ;;  %v5065_v54 = vpop.f32.mrf.mxu1 }
 0x205   :  { %464 = vrot.lane.b32.xlu1 %v5063_v53, %s4906_s30 }
 0x206   :  { %v4438_v55 = vpop.f32.mrf.mxu0  ;;  %v4446_v56 = vpop.f32.mrf.mxu1 }
 0x208   :  { %v5069_v57 = vpop.f32.mrf.mxu0  ;;  %v5071_v58 = vpop.f32.mrf.mxu1 }
 0x209   :  { %541 = vrot.lane.b32.xlu1 %v5065_v54, %s4906_s30  ;;  %772 = vrot.lane.b32.xlu0 %v5069_v57, %s4906_s30 }
 0x20a   :  { %v4439_v59 = vpop.f32.mrf.mxu0  ;;  %v4447_v60 = vpop.f32.mrf.mxu1 }
 0x20d   :  { %695 = vrot.lane.b32.xlu1 %v5059_v50, %s4906_s30 }
 0x211   :  { %849 = vrot.lane.b32.xlu1 %v5071_v58, %s4906_s30 }
 0x26f   :  { %v388_v61 = vpop.permute.xlu1 %387  ;;  %v310_v62 = vpop.permute.xlu0 %309 }
 0x270   :  { %4449 = vmatpush3.xpose.msk.msra.mxu0 %vm311_vm2, %v310_v62  ;;  %4454 = vmatpush3.xpose.msk.msra.mxu1 %vm311_vm2, %v388_v61 }
 0x271   :  { %4458 = vmatprep.subr.mxu0 %v4904_v14  ;;  %4463 = vmatprep.subr.mxu1 %v4904_v14 }
 0x273   :  { %4451 = vmatmul.mubr.msk.f32.vlgmr.msra.gmra.mxu0 %vm311_vm2, %v5049_v45  ;;  %4456 = vmatmul.mubr.msk.f32.vlgmr.msra.gmra.mxu1 %vm311_vm2, %v5051_v46  ;;  %v619_v2 = vpop.permute.xlu0 %618 }
 0x274   :  { %4460 = vmatprep.mubr.msk.f32.mxu0 %vm4905_vm1, %v4904_v14  ;;  %4465 = vmatprep.mubr.msk.f32.mxu1 %vm4905_vm1, %v4904_v14 }
 0x277   :  { %v465_v63 = vpop.permute.xlu1 %464 }
 0x278   :  { %4459 = vmatpush3.xpose.msk.msra.mxu0 %vm311_vm2, %v465_v63 }
 0x279   :  { %4468 = vmatprep.subr.mxu0 %v4904_v14 }
 0x27b   :  { %4461 = vmatmul.mubr.msk.f32.vlgmr.msra.gmra.mxu0 %vm311_vm2, %v5063_v53  ;;  %v542_v3 = vpop.permute.xlu1 %541  ;;  %v773_v4 = vpop.permute.xlu0 %772 }
 0x27c   :  { %4464 = vmatpush3.xpose.msk.msra.mxu1 %vm311_vm2, %v542_v3  ;;  %4469 = vmatpush3.xpose.msk.msra.mxu0 %vm311_vm2, %v619_v2 }
 0x27d   :  { %4470 = vmatprep.mubr.msk.f32.mxu0 %vm4905_vm1, %v4904_v14  ;;  %4473 = vmatprep.subr.mxu1 %v4904_v14 }
 0x27e   :  { %4478 = vmatprep.subr.mxu0 %v4904_v14 }
 0x27f   :  { %4466 = vmatmul.mubr.msk.f32.vlgmr.msra.gmra.mxu1 %vm311_vm2, %v5065_v54  ;;  %4471 = vmatmul.mubr.msk.f32.vlgmr.msra.gmra.mxu0 %vm311_vm2, %v5057_v49  ;;  %v696_v5 = vpop.permute.xlu1 %695 }
 0x280   :  { %4474 = vmatpush3.xpose.msk.msra.mxu1 %vm311_vm2, %v696_v5  ;;  %4479 = vmatpush3.xpose.msk.msra.mxu0 %vm311_vm2, %v773_v4 }
 0x281   :  { %4475 = vmatprep.mubr.msk.f32.mxu1 %vm4905_vm1, %v4904_v14  ;;  %4480 = vmatprep.mubr.msk.f32.mxu0 %vm4905_vm1, %v4904_v14 }
 0x282   :  { %4483 = vmatprep.subr.mxu1 %v4904_v14  ;;  %4488 = vmatprep.subr.mxu0 %v4904_v14 }
 0x283   :  { %4476 = vmatmul.mubr.msk.f32.vlgmr.msra.gmra.mxu1 %vm311_vm2, %v5059_v50  ;;  %v850_v6 = vpop.permute.xlu1 %849  ;;  %4481 = vmatmul.mubr.msk.f32.vlgmr.msra.gmra.mxu0 %vm311_vm2, %v5069_v57 }
 0x284   :  { %4484 = vmatpush3.xpose.msk.msra.mxu1 %vm311_vm2, %v850_v6  ;;  %4485 = vmatprep.mubr.msk.f32.mxu1 %vm4905_vm1, %v4904_v14 }
 0x285   :  { %4493 = vmatprep.subr.mxu1 %v4904_v14  ;;  %4490 = vmatprep.mubr.msk.f32.mxu0 %vm4905_vm1, %v4904_v14 }
 0x287   :  { %4486 = vmatmul.mubr.msk.f32.vlgmr.msra.gmra.mxu1 %vm311_vm2, %v5071_v58 }
 0x288   :  { %4495 = vmatprep.mubr.msk.f32.mxu1 %vm4905_vm1, %v4904_v14 }
 0x333   :  { %v382_v7 = vpop.f32.mrf.mxu0  ;;  %v459_v8 = vpop.f32.mrf.mxu1 }
 0x334   :  { %v928_v9 = vsel %vm311_vm2, %v459_v8, -inf  ;;  %v925_v10 = vsel %vm311_vm2, %v382_v7, -inf }
 0x335   :  { %v4457_v11 = vpop.f32.mrf.mxu1  ;;  %929 = vmax.xlane.f32.xlu1 %v928_v9  ;;  %926 = vmax.xlane.f32.xlu0 %v925_v10  ;;  %v4452_v12 = vpop.f32.mrf.mxu0 }
 0x33b   :  { %v536_v13 = vpop.f32.mrf.mxu0 }
 0x33c   :  { %v931_v15 = vsel %vm311_vm2, %v536_v13, -inf }
 0x33d   :  { %932 = vmax.xlane.f32.xlu0 %v931_v15  ;;  %v4462_v16 = vpop.f32.mrf.mxu0 }
 0x33f   :  { %v613_v17 = vpop.f32.mrf.mxu1  ;;  %v690_v18 = vpop.f32.mrf.mxu0 }
 0x340   :  { %v934_v19 = vsel %vm311_vm2, %v613_v17, -inf  ;;  %v937_v25 = vsel %vm311_vm2, %v690_v18, -inf }
 0x341   :  { %v4467_v20 = vpop.f32.mrf.mxu1  ;;  %935 = vmax.xlane.f32.xlu0 %v934_v19  ;;  %v4472_v21 = vpop.f32.mrf.mxu0 }
 0x343   :  { %v767_v22 = vpop.f32.mrf.mxu1  ;;  %v844_v23 = vpop.f32.mrf.mxu0 }
 0x344   :  { %v940_v24 = vsel %vm311_vm2, %v767_v22, -inf  ;;  %v943_v34 = vsel %vm311_vm2, %v844_v23, -inf }
 0x345   :  { %941 = vmax.xlane.f32.xlu1 %v940_v24  ;;  %v4477_v29 = vpop.f32.mrf.mxu1  ;;  %938 = vmax.xlane.f32.xlu0 %v937_v25  ;;  %v4482_v30 = vpop.f32.mrf.mxu0 }
 0x347   :  { %v921_v31 = vpop.f32.mrf.mxu1 }
 0x348   :  { %v946_v33 = vsel %vm311_vm2, %v921_v31, -inf }
 0x349   :  { %947 = vmax.xlane.f32.xlu1 %v946_v33  ;;  %v4487_v35 = vpop.f32.mrf.mxu1  ;;  %944 = vmax.xlane.f32.xlu0 %v943_v34 }
 0x35a   :  { %1089 = vrot.lane.b32.xlu1 %v5051_v46, %s4907_s10 }
 0x35e   :  { %1165 = vrot.lane.b32.xlu1 %v5063_v53, %s4907_s10 }
 0x35f   :  { %1013 = vrot.lane.b32.xlu0 %v5049_v45, %s4907_s10 }
 0x362   :  { %1241 = vrot.lane.b32.xlu1 %v5065_v54, %s4907_s10 }
 0x363   :  { %1317 = vrot.lane.b32.xlu0 %v5057_v49, %s4907_s10 }
 0x366   :  { %1393 = vrot.lane.b32.xlu1 %v5059_v50, %s4907_s10 }
 0x3be   :  { %v930_v36 = vpop.xlane.xlu1 %929  ;;  %v927_v37 = vpop.xlane.xlu0 %926 }
 0x3bf   :  { %v950_v38 = vsub.f32 %v459_v8, %v930_v36  ;;  %v949_v39 = vsub.f32 %v382_v7, %v927_v37 }
 0x3c1   :  { %v959_v40 = vmul.f32 1.442695, %v950_v38  ;;  %v957_v41 = vmul.f32 1.442695, %v949_v39 }
 0x3c3   :  { %4812 = vpow2.f32 %v959_v40 }
 0x3c4   :  { %4814 = vpow2.f32 %v957_v41 }
 0x3c6   :  { %v933_v42 = vpop.xlane.xlu0 %932 }
 0x3c7   :  { %v951_v43 = vsub.f32 %v536_v13, %v933_v42 }
 0x3c9   :  { %v961_v44 = vmul.f32 1.442695, %v951_v43 }
 0x3ca   :  { %v936_v45 = vpop.xlane.xlu0 %935 }
 0x3cb   :  { %4816 = vpow2.f32 %v961_v44  ;;  %v952_v46 = vsub.f32 %v613_v17, %v936_v45 }
 0x3cd   :  { %v963_v47 = vmul.f32 1.442695, %v952_v46 }
 0x3ce   :  { %v942_v48 = vpop.xlane.xlu1 %941  ;;  %v939_v49 = vpop.xlane.xlu0 %938 }
 0x3cf   :  { %4818 = vpow2.f32 %v963_v47  ;;  %v954_v51 = vsub.f32 %v767_v22, %v942_v48  ;;  %v953_v50 = vsub.f32 %v690_v18, %v939_v49 }
 0x3d0   :  { %v4813_v52 = vpop.eup %4812 }
 0x3d1   :  { %v4815_v53 = vpop.eup %4814  ;;  %v967_v54 = vmul.f32 1.442695, %v954_v51  ;;  %v965_v55 = vmul.f32 1.442695, %v953_v50  ;;  %v976_v56 = vsel %vm311_vm2, %v4813_v52, 0.0 }
 0x3d2   :  { %977 = vadd.xlane.f32.xlu1 %v976_v56  ;;  %v948_v59 = vpop.xlane.xlu1 %947  ;;  %v973_v60 = vsel %vm311_vm2, %v4815_v53, 0.0  ;;  %v945_v61 = vpop.xlane.xlu0 %944  ;;  %v4776_v56 = vld [vmem:[%s5655_s4 + $0x8] sm:$0xff]  }
 0x3d3   :  { %4820 = vpow2.f32 %v967_v54  ;;  %v956_v62 = vsub.f32 %v921_v31, %v948_v59  ;;  %974 = vadd.xlane.f32.xlu0 %v973_v60  ;;  %v955_v63 = vsub.f32 %v844_v23, %v945_v61  ;;  %v4777_v61 = vld [vmem:[%s5655_s4] sm:$0xff]  }
 0x3d4   :  { %4822 = vpow2.f32 %v965_v55 }
 0x3d5   :  { %v971_v2 = vmul.f32 1.442695, %v956_v62  ;;  %v969_v3 = vmul.f32 1.442695, %v955_v63 }
 0x3d6   :  { %v1090_v4 = vpop.permute.xlu1 %1089  ;;  %v1014_v5 = vpop.permute.xlu0 %1013 }
 0x3d7   :  { %4824 = vpow2.f32 %v971_v2  ;;  %4489 = vmatpush3.msra.mxu0 %v1014_v5  ;;  %4494 = vmatpush3.msra.mxu1 %v1090_v4 }
 0x3d8   :  { %v4817_v6 = vpop.eup %4816  ;;  %4826 = vpow2.f32 %v969_v3  ;;  %4503 = vmatprep.subr.mxu1 %v4904_v14  ;;  %4498 = vmatprep.subr.mxu0 %v4904_v14 }
 0x3d9   :  { %v979_v7 = vsel %vm311_vm2, %v4817_v6, 0.0 }
 0x3da   :  { %980 = vadd.xlane.f32.xlu0 %v979_v7  ;;  %v1166_v19 = vpop.permute.xlu1 %1165  ;;  %v1318_v22 = vpop.permute.xlu0 %1317 }
 0x3dc   :  { %v4819_v8 = vpop.eup %4818 }
 0x3dd   :  { %v982_v9 = vsel %vm311_vm2, %v4819_v8, 0.0 }
 0x3de   :  { %983 = vadd.xlane.f32.xlu1 %v982_v9  ;;  %v1242_v20 = vpop.permute.xlu1 %1241 }
 0x3e0   :  { %v4821_v10 = vpop.eup %4820 }
 0x3e1   :  { %v4823_v11 = vpop.eup %4822  ;;  %v988_v12 = vsel %vm311_vm2, %v4821_v10, 0.0 }
 0x3e2   :  { %989 = vadd.xlane.f32.xlu1 %v988_v12  ;;  %v985_v13 = vsel %vm311_vm2, %v4823_v11, 0.0  ;;  %v1394_v21 = vpop.permute.xlu1 %1393 }
 0x3e3   :  { %986 = vadd.xlane.f32.xlu0 %v985_v13 }
 0x3e4   :  { %v5157_v15 = vpop.eup %4824 }
 0x3e5   :  { %v5159_v16 = vpop.eup %4826  ;;  %v994_v17 = vsel %vm311_vm2, %v5157_v15, 0.0 }
 0x3e6   :  { %995 = vadd.xlane.f32.xlu1 %v994_v17  ;;  %v991_v18 = vsel %vm311_vm2, %v5159_v16, 0.0 }
 0x3e7   :  { %992 = vadd.xlane.f32.xlu0 %v991_v18 }
 0x3f7   :  { %1545 = vrot.lane.b32.xlu1 %v5071_v58, %s4907_s10 }
 0x3fd   :  { %1469 = vrot.lane.b32.xlu0 %v5069_v57, %s4907_s10 }
 0x45b   :  { %v978_v23 = vpop.xlane.xlu1 %977 }
 0x45c   :  { %4828 = vrcp.f32 %v978_v23  ;;  %v975_v24 = vpop.xlane.xlu0 %974 }
 0x45d   :  { %4830 = vrcp.f32 %v975_v24 }
 0x463   :  { %v981_v25 = vpop.xlane.xlu0 %980 }
 0x464   :  { %4832 = vrcp.f32 %v981_v25 }
 0x467   :  { %v984_v29 = vpop.xlane.xlu1 %983 }
 0x468   :  { %4834 = vrcp.f32 %v984_v29 }
 0x469   :  { %v4829_v30 = vpop.eup %4828 }
 0x46a   :  { %v4831_v31 = vpop.eup %4830  ;;  %v1006_v33 = vmul.f32 %v4829_v30, %v4813_v52 }
 0x46b   :  { %v990_v34 = vpop.xlane.xlu1 %989  ;;  %v1005_v58 = vmul.f32 %v4831_v31, %v4815_v53 }
 0x46c   :  { %4836 = vrcp.f32 %v990_v34  ;;  %v987_v35 = vpop.xlane.xlu0 %986  ;;  %4496 = vmatmul.mubr.msk.f32.vlgmr.msra.gmra.mxu1 %vm311_vm2, %v1006_v33  ;;  %v1718_v33 = vsub.s32 4, %v5004_v26 }
 0x46d   :  { %4838 = vrcp.f32 %v987_v35  ;;  %4491 = vmatmul.mubr.msk.f32.vlgmr.msra.gmra.mxu0 %vm311_vm2, %v1005_v58  ;;  %4504 = vmatpush3.msra.mxu1 %v1242_v20 }
 0x46e   :  { %4499 = vmatpush3.msra.mxu0 %v1166_v19  ;;  %4500 = vmatprep.mubr.msk.f32.mxu0 %vm4905_vm1, %v4904_v14  ;;  %v1719_v34 = vrot.slane %v5012_v28, %v1718_v33 }
 0x46f   :  { %v996_v57 = vpop.xlane.xlu1 %995  ;;  %4508 = vmatprep.subr.mxu0 %v4904_v14  ;;  %4505 = vmatprep.mubr.msk.f32.mxu1 %vm4905_vm1, %v4904_v14 }
 0x470   :  { %4840 = vrcp.f32 %v996_v57  ;;  %v993_v36 = vpop.xlane.xlu0 %992  ;;  %4513 = vmatprep.subr.mxu1 %v4904_v14 }
 0x471   :  { %v4833_v37 = vpop.eup %4832  ;;  %4842 = vrcp.f32 %v993_v36 }
 0x472   :  { %v1007_v38 = vmul.f32 %v4833_v37, %v4817_v6 }
 0x473   :  { %v1546_v45 = vpop.permute.xlu1 %1545 }
 0x474   :  { %4501 = vmatmul.mubr.msk.f32.vlgmr.msra.gmra.mxu0 %vm311_vm2, %v1007_v38  ;;  %v1470_v47 = vpop.permute.xlu0 %1469 }
 0x475   :  { %v4835_v39 = vpop.eup %4834  ;;  %4509 = vmatpush3.msra.mxu0 %v1318_v22  ;;  %4510 = vmatprep.mubr.msk.f32.mxu0 %vm4905_vm1, %v4904_v14 }
 0x476   :  { %v1008_v40 = vmul.f32 %v4835_v39, %v4819_v8  ;;  %4518 = vmatprep.subr.mxu0 %v4904_v14 }
 0x478   :  { %4506 = vmatmul.mubr.msk.f32.vlgmr.msra.gmra.mxu1 %vm311_vm2, %v1008_v40 }
 0x479   :  { %v4837_v41 = vpop.eup %4836  ;;  %4514 = vmatpush3.msra.mxu1 %v1394_v21  ;;  %4515 = vmatprep.mubr.msk.f32.mxu1 %vm4905_vm1, %v4904_v14 }
 0x47a   :  { %v4839_v42 = vpop.eup %4838  ;;  %4523 = vmatprep.subr.mxu1 %v4904_v14  ;;  %v1010_v43 = vmul.f32 %v4837_v41, %v4821_v10 }
 0x47b   :  { %v1009_v44 = vmul.f32 %v4839_v42, %v4823_v11 }
 0x47c   :  { %4516 = vmatmul.mubr.msk.f32.vlgmr.msra.gmra.mxu1 %vm311_vm2, %v1010_v43 }
 0x47d   :  { %v4841_v46 = vpop.eup %4840  ;;  %4511 = vmatmul.mubr.msk.f32.vlgmr.msra.gmra.mxu0 %vm311_vm2, %v1009_v44  ;;  %4524 = vmatpush3.msra.mxu1 %v1546_v45 }
 0x47e   :  { %v4843_v48 = vpop.eup %4842  ;;  %4519 = vmatpush3.msra.mxu0 %v1470_v47  ;;  %4520 = vmatprep.mubr.msk.f32.mxu0 %vm4905_vm1, %v4904_v14  ;;  %v1012_v49 = vmul.f32 %v4841_v46, %v5157_v15 }
 0x47f   :  { %4525 = vmatprep.mubr.msk.f32.mxu1 %vm4905_vm1, %v4904_v14  ;;  %v1011_v51 = vmul.f32 %v4843_v48, %v5159_v16  ;;  %4528 = vmatprep.subr.bf16.mxu0 %v4904_v14 }
 0x480   :  { %4526 = vmatmul.mubr.msk.f32.vlgmr.msra.gmra.mxu1 %vm311_vm2, %v1012_v49  ;;  %4536 = vmatprep.subr.bf16.mxu1 %v4904_v14 }
 0x481   :  { %4521 = vmatmul.mubr.msk.f32.vlgmr.msra.gmra.mxu0 %vm311_vm2, %v1011_v51  ;;  %4540 = vmatprep.mubr.msk.bf16.mxu1 %vm4905_vm1, %v4904_v14 }
 0x482   :  { %4532 = vmatprep.mubr.msk.bf16.mxu0 %vm4905_vm1, %v4904_v14  ;;  %4529 = vmatpush3.bf16.msra.mxu0 %v4776_v56 }
 0x483   :  { %4530 = vmatprep.subr.bf16.mxu0 %v4904_v14 }
 0x486   :  { %4531 = vmatpush3.bf16.msra.mxu0 %v4777_v61  ;;  %v5248_v61 = vsub.s32 2, %v5004_v26 }
 0x487   :  { %4544 = vmatprep.subr.bf16.mxu0 %v4904_v14 }
 0x52c   :  { %v1161_v50 = vpop.f32.mrf.mxu1 }
 0x52d   :  { %v1085_v52 = vpop.f32.mrf.mxu0 }
 0x52e   :  { %v4497_v53 = vpop.f32.mrf.mxu1 }
 0x52f   :  { %v4492_v54 = vpop.f32.mrf.mxu0 }
 0x534   :  { %v1237_v55 = vpop.f32.mrf.mxu0 }
 0x536   :  { %v4502_v59 = vpop.f32.mrf.mxu0 }
 0x538   :  { %v1313_v60 = vpop.f32.mrf.mxu1 }
 0x53a   :  { %v4507_v62 = vpop.f32.mrf.mxu1 }
 0x53c   :  { %v1465_v63 = vpop.f32.mrf.mxu1 }
 0x53d   :  { %v1389_v2 = vpop.f32.mrf.mxu0  ;;  %v4738_v3 = vpack.i.bf16 %v1465_v63, %v1161_v50  ;;  %v4778_v50 = vld [vmem:[%s5656_s5 + $0x8] sm:$0xff]  }
 0x53e   :  { %v4517_v4 = vpop.f32.mrf.mxu1  ;;  %4537 = vmatpush3.bf16.msra.mxu1 %v4778_v50 }
 0x53f   :  { %v4512_v5 = vpop.f32.mrf.mxu0  ;;  %4739 = vrot.lane.b32.xlu0 %v4738_v3, %s4908_s14  ;;  %4538 = vmatprep.subr.bf16.mxu1 %v4904_v14  ;;  %v5253_v3 = vsub.s32 3, %v5004_v26 }
 0x540   :  { %v1617_v6 = vpop.f32.mrf.mxu1 }
 0x541   :  { %v1541_v7 = vpop.f32.mrf.mxu0  ;;  %v4748_v8 = vpack.i.bf16 %v1617_v6, %v1313_v60 }
 0x542   :  { %v4743_v9 = vpack.i.bf16 %v1541_v7, %v1237_v55  ;;  %v4527_v10 = vpop.f32.mrf.mxu1  ;;  %v1757_v7 = vrot.slane %v5012_v28, %v5253_v3 }
 0x543   :  { %v4522_v11 = vpop.f32.mrf.mxu0  ;;  %4749 = vrot.lane.b32.xlu0 %v4748_v8, %s4909_s15 }
 0x544   :  { %4744 = vrot.lane.b32.xlu1 %v4743_v9, %s4910_s16 }
 0x5b1   :  { %v4740_v12 = vpop.permute.xlu0 %4739 }
 0x5b2   :  { %v4742_v13 = vunpack.i.h.bf16 %v4740_v12  ;;  %v4741_v15 = vunpack.i.l.bf16 %v4740_v12  ;;  %v4780_v12 = vld [vmem:[%s5657_s6 + $0x18] sm:$0xff]  }
 0x5b4   :  { %v1633_v22 = vsel %vm311_vm2, %v1085_v52, %v4741_v15  ;;  %v1650_v23 = vsel %vm311_vm2, %v1389_v2, %v4742_v13  ;;  %v4779_v52 = vld [vmem:[%s5656_s5] sm:$0xff]   ;;  %v1751_v2 = vrot.slane %v5012_v28, %v5248_v61  ;;  %v4781_v13 = vld [vmem:[%s5657_s6 + $0x10] sm:$0xff]   ;;  %v4782_v15 = vld [vmem:[%s5657_s6 + $0x8] sm:$0xff]  }
 0x5b5   :  { %v4750_v16 = vpop.permute.xlu0 %4749  ;;  %4539 = vmatpush3.bf16.msra.mxu1 %v4779_v52 }
 0x5b6   :  { %v4752_v17 = vunpack.i.h.bf16 %v4750_v16  ;;  %v4751_v18 = vunpack.i.l.bf16 %v4750_v16  ;;  %v4745_v19 = vpop.permute.xlu1 %4744  ;;  %4556 = vmatprep.subr.bf16.mxu1 %v4904_v14  ;;  %v4783_v16 = vld [vmem:[%s5657_s6] sm:$0xff]  }
 0x5b7   :  { %v4747_v20 = vunpack.i.h.bf16 %v4745_v19  ;;  %v4746_v21 = vunpack.i.l.bf16 %v4745_v19 }
 0x5b9   :  { %v1651_v24 = vsel %vm1634_vm3, %v1650_v23, %v4747_v20  ;;  %v1635_v25 = vsel %vm1634_vm3, %v1633_v22, %v4746_v21 }
 0x5ba   :  { %v1652_v29 = vsel %vm1636_vm4, %v1651_v24, %v4752_v17  ;;  %v1637_v30 = vsel %vm1636_vm4, %v1635_v25, %v4751_v18  ;;  %v1767_v17 = vsub.s32 6, %v5004_v26 }
 0x5bb   :  { %v1653_v31 = vpack.c.bf16 %v1652_v29, %v1637_v30 }
 0x5bc   :  { %v1768_v18 = vrot.slane %v5012_v28, %v1767_v17 }
 0x5bd   :  { %4533 = vmatmul.mubr.msk.bf16.vlgmr.msra.gmra.mxu0 %vm36_vm0, %v1653_v31 }
 0x5be   :  { %4552 = vmatprep.mubr.msk.bf16.mxu0 %vm4905_vm1, %v4904_v14  ;;  %4545 = vmatpush3.bf16.msra.mxu0 %v4780_v12 }
 0x5bf   :  { %4546 = vmatprep.subr.bf16.mxu0 %v4904_v14 }
 0x5c2   :  { %4547 = vmatpush3.bf16.msra.mxu0 %v4781_v13 }
 0x5c3   :  { %4548 = vmatprep.subr.bf16.mxu0 %v4904_v14 }
 0x5c6   :  { %4549 = vmatpush3.bf16.msra.mxu0 %v4782_v15 }
 0x5c7   :  { %4550 = vmatprep.subr.bf16.mxu0 %v4904_v14 }
 0x5ca   :  { %4551 = vmatpush3.bf16.msra.mxu0 %v4783_v16 }
 0x5cb   :  { %4572 = vmatprep.subr.bf16.mxu0 %v4904_v14 }
 0x67d   :  { %v1707_v58 = vpop.f32.mrf.mxu0 }
 0x67e   :  { %v1714_v35 = vadd.f32 %v1707_v58, %v4967_v0 }
 0x67f   :  { %v4534_v57 = vpop.f32.mrf.mxu0 }
 0x680   :  { %v5226_v36 = vadd.f32 %v1719_v34, %v1714_v35 }
 0x681   :  { %v1710_v37 = vpop.f32.mrf.mxu0 }
 0x682   :  { %v1715_v38 = vadd.f32 %v1710_v37, %v4972_v1  ;;  %v1722_v39 = vsel %vm36_vm0, %v5226_v36, 0.0 }
 0x683   :  { %1723 = vadd.xlane.f32.xlu1 %v1722_v39  ;;  %v4535_v40 = vpop.f32.mrf.mxu0 }
 0x684   :  { %v5231_v41 = vadd.f32 %v1719_v34, %v1715_v38  ;;  %v1846_v40 = vsub.s32 5, %v5004_v26  ;;  %v4802_v26 = vld [vmem:[%s5658_s7 + $0x18] sm:$0xff]  }
 0x686   :  { %v1725_v42 = vsel %vm36_vm0, %v5231_v41, 0.0 }
 0x687   :  { %1726 = vadd.xlane.f32.xlu0 %v1725_v42  ;;  %v1847_v42 = vrot.slane %v5012_v28, %v1846_v40 }
 0x70c   :  { %v1724_v43 = vpop.xlane.xlu1 %1723 }
 0x70d   :  { %v1728_v44 = vmul.f32 0.03125, %v1724_v43 }
 0x70f   :  { %v1730_v0 = vsub.f32 %v5226_v36, %v1728_v44 }
 0x710   :  { %v1727_v45 = vpop.xlane.xlu0 %1726 }
 0x711   :  { %v1729_v46 = vmul.f32 0.03125, %v1727_v45  ;;  %v1732_v47 = vmul.f32 %v1730_v0, %v1730_v0 }
 0x713   :  { %v1731_v1 = vsub.f32 %v5231_v41, %v1729_v46  ;;  %v1734_v48 = vsel %vm36_vm0, %v1732_v47, 0.0 }
 0x714   :  { %1735 = vadd.xlane.f32.xlu0 %v1734_v48 }
 0x715   :  { %v1733_v49 = vmul.f32 %v1731_v1, %v1731_v1 }
 0x717   :  { %v1737_v51 = vsel %vm36_vm0, %v1733_v49, 0.0 }
 0x718   :  { %1738 = vadd.xlane.f32.xlu0 %v1737_v51 }
 0x79d   :  { %v1736_v53 = vpop.xlane.xlu0 %1735 }
 0x79e   :  { %v1740_v54 = vmul.f32 0.03125, %v1736_v53 }
 0x7a0   :  { %v1742_v55 = vadd.f32 1e-05, %v1740_v54 }
 0x7a1   :  { %v1739_v56 = vpop.xlane.xlu0 %1738 }
 0x7a2   :  { %4844 = vrsqrt.f32 %v1742_v55  ;;  %v1741_v59 = vmul.f32 0.03125, %v1739_v56 }
 0x7a4   :  { %v1743_v60 = vadd.f32 1e-05, %v1741_v59 }
 0x7a6   :  { %4846 = vrsqrt.f32 %v1743_v60  ;;  %v4784_v60 = vld [vmem:[%s5653_s3 + $0x48] sm:$0xff]  }
 0x7af   :  { %v4845_v62 = vpop.eup %4844 }
 0x7b0   :  { %v1746_v63 = vmul.f32 %v4845_v62, %v1730_v0  ;;  %v4785_v62 = vld [vmem:[%s5653_s3 + $0x68] sm:$0xff]  }
 0x7b2   :  { %v1752_v6 = vmul.f32 %v1751_v2, %v1746_v63  ;;  %v4786_v63 = vld [vmem:[%s5653_s3 + $0x40] sm:$0xff]  }
 0x7b3   :  { %v4847_v4 = vpop.eup %4846 }
 0x7b4   :  { %v1747_v5 = vmul.f32 %v4847_v4, %v1731_v1  ;;  %v1758_v9 = vadd.f32 %v1757_v7, %v1752_v6 }
 0x7b6   :  { %v1753_v8 = vmul.f32 %v1751_v2, %v1747_v5  ;;  %v4787_v2 = vld [vmem:[%s5653_s3 + $0x60] sm:$0xff]  }
 0x7b8   :  { %v1759_v10 = vadd.f32 %v1757_v7, %v1753_v8 }
 0x7ba   :  { %v1760_v11 = vpack.c.bf16 %v1759_v10, %v1758_v9  ;;  %v5320_v10 = vld [vmem:[%s5654_s2 + $0x8] sm:$0x7f] }
 0x7bb   :  { %v1950_v13 = vrot.slane %v5320_v10, %v5007_v27 }
 0x7bc   :  { %4541 = vmatmul.mubr.msk.bf16.vlgmr.msra.gmra.mxu1 %vm36_vm0, %v1760_v11 }
 0x7bd   :  { %4560 = vmatprep.mubr.msk.bf16.mxu1 %vm4905_vm1, %v4904_v14  ;;  %4557 = vmatpush3.bf16.msra.mxu1 %v4784_v60 }
 0x7be   :  { %4558 = vmatprep.subr.bf16.mxu1 %v4904_v14 }
 0x7c1   :  { %4559 = vmatpush3.bf16.msra.mxu1 %v4786_v63 }
 0x7c2   :  { %4564 = vmatprep.subr.bf16.mxu1 %v4904_v14 }
 0x87c   :  { %v1818_v19 = vpop.f32.mrf.mxu1 }
 0x87d   :  { %v1819_v20 = vadd.f32 %v1818_v19, %v1768_v18  ;;  %v1956_v19 = vrot.slane %v5320_v10, %v5017_v32 }
 0x87e   :  { %v4542_v21 = vpop.f32.mrf.mxu1 }
 0x87f   :  { %v1827_v22 = vmul.f32 0.70710677, %v1819_v20  ;;  %v1825_v58 = vmul.f32 0.5, %v1819_v20 }
 0x880   :  { %v1821_v23 = vpop.f32.mrf.mxu1 }
 0x881   :  { %4848 = verf.f32 %v1827_v22  ;;  %v1822_v24 = vadd.f32 %v1821_v23, %v1768_v18  ;;  %v4788_v23 = vld [vmem:[%s5653_s3 + $0x58] sm:$0xff]  }
 0x882   :  { %v4543_v25 = vpop.f32.mrf.mxu1 }
 0x883   :  { %v1828_v29 = vmul.f32 0.70710677, %v1822_v24  ;;  %v1826_v35 = vmul.f32 0.5, %v1822_v24  ;;  %v4789_v25 = vld [vmem:[%s5653_s3 + $0x50] sm:$0xff]  }
 0x885   :  { %4850 = verf.f32 %v1828_v29  ;;  %v4790_v29 = vld [vmem:[%s5653_s3 + $0x78] sm:$0xff]  }
 0x88e   :  { %v4849_v30 = vpop.eup %4848 }
 0x88f   :  { %v1831_v31 = vadd.f32 1.0, %v4849_v30  ;;  %v4791_v30 = vld [vmem:[%s5653_s3 + $0x70] sm:$0xff]  }
 0x891   :  { %v1833_v37 = vmul.f32 %v1831_v31, %v1825_v58 }
 0x892   :  { %v4851_v34 = vpop.eup %4850 }
 0x893   :  { %v1832_v57 = vadd.f32 1.0, %v4851_v34 }
 0x895   :  { %v1834_v38 = vmul.f32 %v1832_v57, %v1826_v35 }
 0x897   :  { %v1835_v39 = vpack.c.bf16 %v1834_v38, %v1833_v37 }
 0x899   :  { %4553 = vmatmul.mubr.msk.bf16.vlgmr.msra.gmra.mxu0 %vm1872_vm5, %v1835_v39 }
 0x89a   :  { %4576 = vmatprep.mubr.msk.bf16.mxu0 %vm4905_vm1, %v4904_v14  ;;  %4573 = vmatpush3.bf16.msra.mxu0 %v4785_v62 }
 0x89b   :  { %4574 = vmatprep.subr.bf16.mxu0 %v4904_v14 }
 0x89e   :  { %4575 = vmatpush3.bf16.msra.mxu0 %v4787_v2 }
 0x89f   :  { %4588 = vmatprep.subr.mxu0 %v4904_v14 }
 0x959   :  { %v1910_v43 = vpop.f32.mrf.mxu0 }
 0x95a   :  { %v1911_v44 = vadd.f32 %v1910_v43, %v1847_v42 }
 0x95b   :  { %v4554_v0 = vpop.f32.mrf.mxu0 }
 0x95c   :  { %v5288_v45 = vadd.f32 %v1911_v44, %v5226_v36 }
 0x95d   :  { %v1913_v46 = vpop.f32.mrf.mxu0 }
 0x95e   :  { %v1914_v47 = vadd.f32 %v1913_v46, %v1847_v42  ;;  %v1921_v1 = vsel %vm36_vm0, %v5288_v45, 0.0 }
 0x95f   :  { %1922 = vadd.xlane.f32.xlu1 %v1921_v1  ;;  %v4555_v48 = vpop.f32.mrf.mxu0 }
 0x960   :  { %v5293_v49 = vadd.f32 %v1914_v47, %v5231_v41 }
 0x962   :  { %v1924_v51 = vsel %vm36_vm0, %v5293_v49, 0.0 }
 0x963   :  { %1925 = vadd.xlane.f32.xlu0 %v1924_v51 }
 0x9e8   :  { %v1923_v28 = vpop.xlane.xlu1 %1922 }
 0x9e9   :  { %v1927_v50 = vmul.f32 0.03125, %v1923_v28 }
 0x9eb   :  { %v1929_v52 = vsub.f32 %v5288_v45, %v1927_v50 }
 0x9ec   :  { %v1926_v36 = vpop.xlane.xlu0 %1925 }
 0x9ed   :  { %v1928_v53 = vmul.f32 0.03125, %v1926_v36  ;;  %v1931_v54 = vmul.f32 %v1929_v52, %v1929_v52 }
 0x9ef   :  { %v1930_v55 = vsub.f32 %v5293_v49, %v1928_v53  ;;  %v1933_v56 = vsel %vm36_vm0, %v1931_v54, 0.0 }
 0x9f0   :  { %1934 = vadd.xlane.f32.xlu1 %v1933_v56 }
 0x9f1   :  { %v1932_v59 = vmul.f32 %v1930_v55, %v1930_v55 }
 0x9f3   :  { %v1936_v41 = vsel %vm36_vm0, %v1932_v59, 0.0 }
 0x9f4   :  { %1937 = vadd.xlane.f32.xlu0 %v1936_v41 }
 0xa79   :  { %v1935_v4 = vpop.xlane.xlu1 %1934 }
 0xa7a   :  { %v1939_v5 = vmul.f32 0.03125, %v1935_v4 }
 0xa7c   :  { %v1941_v6 = vadd.f32 1e-05, %v1939_v5 }
 0xa7d   :  { %v1938_v7 = vpop.xlane.xlu0 %1937 }
 0xa7e   :  { %4852 = vrsqrt.f32 %v1941_v6  ;;  %v1940_v8 = vmul.f32 0.03125, %v1938_v7 }
 0xa80   :  { %v1942_v9 = vadd.f32 1e-05, %v1940_v8 }
 0xa82   :  { %4854 = vrsqrt.f32 %v1942_v9 }
 0xa8b   :  { %v4853_v11 = vpop.eup %4852 }
 0xa8c   :  { %v1945_v12 = vmul.f32 %v4853_v11, %v1929_v52 }
 0xa8e   :  { %v1951_v18 = vmul.f32 %v1950_v13, %v1945_v12 }
 0xa8f   :  { %v4855_v15 = vpop.eup %4854 }
 0xa90   :  { %v1946_v16 = vmul.f32 %v4855_v15, %v1930_v55  ;;  %v1957_v21 = vadd.f32 %v1956_v19, %v1951_v18 }
 0xa92   :  { %v1952_v20 = vmul.f32 %v1950_v13, %v1946_v16 }
 0xa94   :  { %v1958_v22 = vadd.f32 %v1956_v19, %v1952_v20 }
 0xa96   :  { %v1959_v24 = vpack.c.bf16 %v1958_v22, %v1957_v21 }
 0xa98   :  { %4561 = vmatmul.mubr.msk.bf16.vlgmr.msra.gmra.mxu1 %vm36_vm0, %v1959_v24  ;;  %4577 = vmatmul.mubr.msk.bf16.vlgmr.msra.gmra.mxu0 %vm36_vm0, %v1959_v24 }
 0xa99   :  { %4565 = vmatpush3.bf16.msra.mxu1 %v4788_v23  ;;  %4568 = vmatprep.mubr.msk.bf16.mxu1 %vm4905_vm1, %v4904_v14 }
 0xa9a   :  { %4566 = vmatprep.subr.bf16.mxu1 %v4904_v14  ;;  %4590 = vmatprep.mubr.msk.f32.mxu0 %vm4905_vm1, %v4904_v14 }
 0xa9d   :  { %4567 = vmatpush3.bf16.msra.mxu1 %v4789_v25 }
 0xa9e   :  { %4580 = vmatprep.subr.bf16.mxu1 %v4904_v14 }
 0xaa0   :  { %4569 = vmatmul.mubr.msk.bf16.vlgmr.msra.gmra.mxu1 %vm36_vm0, %v1959_v24 }
 0xaa1   :  { %4581 = vmatpush3.bf16.msra.mxu1 %v4790_v29  ;;  %4584 = vmatprep.mubr.msk.bf16.mxu1 %vm4905_vm1, %v4904_v14 }
 0xaa2   :  { %4582 = vmatprep.subr.bf16.mxu1 %v4904_v14 }
 0xaa5   :  { %4583 = vmatpush3.bf16.msra.mxu1 %v4791_v30 }
 0xaa6   :  { %4593 = vmatprep.subr.mxu1 %v4904_v14 }
 0xaa8   :  { %4585 = vmatmul.mubr.msk.bf16.vlgmr.msra.gmra.mxu1 %vm36_vm0, %v1959_v24 }
 0xaa9   :  { %4595 = vmatprep.mubr.msk.f32.mxu1 %vm4905_vm1, %v4904_v14 }
 0xb58   :  { %v5354_v31 = vpop.f32.mrf.mxu1  ;;  %v5356_v34 = vpop.f32.mrf.mxu0 }
 0xb59   :  { %2193 = vrot.lane.b32.xlu1 %v5354_v31, %s4906_s30 }
 0xb5a   :  { %v4562_v58 = vpop.f32.mrf.mxu1  ;;  %v4578_v35 = vpop.f32.mrf.mxu0 }
 0xb5c   :  { %v5360_v57 = vpop.f32.mrf.mxu1  ;;  %v5362_v37 = vpop.f32.mrf.mxu0 }
 0xb5d   :  { %2347 = vrot.lane.b32.xlu1 %v5356_v34, %s4906_s30 }
 0xb5e   :  { %v4563_v38 = vpop.f32.mrf.mxu1  ;;  %v4579_v39 = vpop.f32.mrf.mxu0 }
 0xb60   :  { %v5366_v42 = vpop.f32.mrf.mxu1 }
 0xb61   :  { %2270 = vrot.lane.b32.xlu0 %v5366_v42, %s4906_s30 }
 0xb62   :  { %v4570_v43 = vpop.f32.mrf.mxu1 }
 0xb64   :  { %v5370_v44 = vpop.f32.mrf.mxu1 }
 0xb65   :  { %2578 = vrot.lane.b32.xlu0 %v5370_v44, %s4906_s30 }
 0xb66   :  { %v4571_v0 = vpop.f32.mrf.mxu1 }
 0xb68   :  { %v5374_v46 = vpop.f32.mrf.mxu1 }
 0xb69   :  { %2424 = vrot.lane.b32.xlu1 %v5374_v46, %s4906_s30 }
 0xb6a   :  { %v4586_v47 = vpop.f32.mrf.mxu1 }
 0xb6c   :  { %v5378_v1 = vpop.f32.mrf.mxu1 }
 0xb6d   :  { %2732 = vrot.lane.b32.xlu0 %v5378_v1, %s4906_s30  ;;  %2501 = vrot.lane.b32.xlu1 %v5360_v57, %s4906_s30 }
 0xb6e   :  { %v4587_v48 = vpop.f32.mrf.mxu1 }
 0xb71   :  { %2655 = vrot.lane.b32.xlu1 %v5362_v37, %s4906_s30 }
 0xbcb   :  { %v2194_v51 = vpop.permute.xlu1 %2193 }
 0xbcc   :  { %4589 = vmatpush3.xpose.msk.msra.mxu0 %vm311_vm2, %v2194_v51 }
 0xbcd   :  { %4598 = vmatprep.subr.mxu0 %v4904_v14 }
 0xbcf   :  { %4591 = vmatmul.mubr.msk.f32.vlgmr.msra.gmra.mxu0 %vm311_vm2, %v5354_v31  ;;  %v2348_v28 = vpop.permute.xlu1 %2347 }
 0xbd0   :  { %4599 = vmatpush3.xpose.msk.msra.mxu0 %vm311_vm2, %v2348_v28  ;;  %4600 = vmatprep.mubr.msk.f32.mxu0 %vm4905_vm1, %v4904_v14 }
 0xbd1   :  { %4608 = vmatprep.subr.mxu0 %v4904_v14 }
 0xbd3   :  { %v2271_v50 = vpop.permute.xlu0 %2270  ;;  %4601 = vmatmul.mubr.msk.f32.vlgmr.msra.gmra.mxu0 %vm311_vm2, %v5356_v34 }
 0xbd4   :  { %4594 = vmatpush3.xpose.msk.msra.mxu1 %vm311_vm2, %v2271_v50  ;;  %4610 = vmatprep.mubr.msk.f32.mxu0 %vm4905_vm1, %v4904_v14 }
 0xbd5   :  { %4603 = vmatprep.subr.mxu1 %v4904_v14 }
 0xbd7   :  { %4596 = vmatmul.mubr.msk.f32.vlgmr.msra.gmra.mxu1 %vm311_vm2, %v5366_v42  ;;  %v2579_v36 = vpop.permute.xlu0 %2578 }
 0xbd8   :  { %4605 = vmatprep.mubr.msk.f32.mxu1 %vm4905_vm1, %v4904_v14 }
 0xbdb   :  { %v2425_v52 = vpop.permute.xlu1 %2424 }
 0xbdc   :  { %4604 = vmatpush3.xpose.msk.msra.mxu1 %vm311_vm2, %v2425_v52 }
 0xbdd   :  { %4613 = vmatprep.subr.mxu1 %v4904_v14 }
 0xbdf   :  { %4606 = vmatmul.mubr.msk.f32.vlgmr.msra.gmra.mxu1 %vm311_vm2, %v5374_v46  ;;  %v2502_v53 = vpop.permute.xlu1 %2501  ;;  %v2733_v54 = vpop.permute.xlu0 %2732 }
 0xbe0   :  { %4609 = vmatpush3.xpose.msk.msra.mxu0 %vm311_vm2, %v2502_v53  ;;  %4614 = vmatpush3.xpose.msk.msra.mxu1 %vm311_vm2, %v2579_v36 }
 0xbe1   :  { %4615 = vmatprep.mubr.msk.f32.mxu1 %vm4905_vm1, %v4904_v14  ;;  %4618 = vmatprep.subr.mxu0 %v4904_v14 }
 0xbe2   :  { %4623 = vmatprep.subr.mxu1 %v4904_v14 }
 0xbe3   :  { %4611 = vmatmul.mubr.msk.f32.vlgmr.msra.gmra.mxu0 %vm311_vm2, %v5360_v57  ;;  %4616 = vmatmul.mubr.msk.f32.vlgmr.msra.gmra.mxu1 %vm311_vm2, %v5370_v44  ;;  %v2656_v55 = vpop.permute.xlu1 %2655 }
 0xbe4   :  { %4619 = vmatpush3.xpose.msk.msra.mxu0 %vm311_vm2, %v2656_v55  ;;  %4624 = vmatpush3.xpose.msk.msra.mxu1 %vm311_vm2, %v2733_v54 }
 0xbe5   :  { %4620 = vmatprep.mubr.msk.f32.mxu0 %vm4905_vm1, %v4904_v14  ;;  %4625 = vmatprep.mubr.msk.f32.mxu1 %vm4905_vm1, %v4904_v14 }
 0xbe6   :  { %4628 = vmatprep.subr.mxu0 %v4904_v14  ;;  %4633 = vmatprep.subr.mxu1 %v4904_v14 }
 0xbe7   :  { %4621 = vmatmul.mubr.msk.f32.vlgmr.msra.gmra.mxu0 %vm311_vm2, %v5362_v37  ;;  %4626 = vmatmul.mubr.msk.f32.vlgmr.msra.gmra.mxu1 %vm311_vm2, %v5378_v1 }
 0xbe8   :  { %4630 = vmatprep.mubr.msk.f32.mxu0 %vm4905_vm1, %v4904_v14  ;;  %4635 = vmatprep.mubr.msk.f32.mxu1 %vm4905_vm1, %v4904_v14 }
 0xc8f   :  { %v2265_v56 = vpop.f32.mrf.mxu0 }
 0xc90   :  { %v2808_v59 = vsel %vm311_vm2, %v2265_v56, -inf }
 0xc91   :  { %2809 = vmax.xlane.f32.xlu1 %v2808_v59  ;;  %v4592_v41 = vpop.f32.mrf.mxu0 }
 0xc93   :  { %v2419_v60 = vpop.f32.mrf.mxu0 }
 0xc94   :  { %v2814_v62 = vsel %vm311_vm2, %v2419_v60, -inf }
 0xc95   :  { %2815 = vmax.xlane.f32.xlu0 %v2814_v62  ;;  %v4602_v63 = vpop.f32.mrf.mxu0 }
 0xc97   :  { %v2342_v2 = vpop.f32.mrf.mxu1 }
 0xc98   :  { %v2811_v4 = vsel %vm311_vm2, %v2342_v2, -inf }
 0xc99   :  { %v4597_v5 = vpop.f32.mrf.mxu1  ;;  %2812 = vmax.xlane.f32.xlu0 %v2811_v4 }
 0xc9f   :  { %v2496_v6 = vpop.f32.mrf.mxu1 }
 0xca0   :  { %v2817_v7 = vsel %vm311_vm2, %v2496_v6, -inf }
 0xca1   :  { %v4607_v8 = vpop.f32.mrf.mxu1  ;;  %2818 = vmax.xlane.f32.xlu0 %v2817_v7 }
 0xca3   :  { %v2573_v9 = vpop.f32.mrf.mxu0  ;;  %v2650_v11 = vpop.f32.mrf.mxu1 }
 0xca4   :  { %v2823_v12 = vsel %vm311_vm2, %v2650_v11, -inf  ;;  %v2820_v13 = vsel %vm311_vm2, %v2573_v9, -inf }
 0xca5   :  { %v4617_v15 = vpop.f32.mrf.mxu1  ;;  %2824 = vmax.xlane.f32.xlu0 %v2823_v12  ;;  %2821 = vmax.xlane.f32.xlu1 %v2820_v13  ;;  %v4612_v16 = vpop.f32.mrf.mxu0 }
 0xca7   :  { %v2727_v18 = vpop.f32.mrf.mxu0  ;;  %v2804_v19 = vpop.f32.mrf.mxu1 }
 0xca8   :  { %v2829_v20 = vsel %vm311_vm2, %v2804_v19, -inf  ;;  %v2826_v21 = vsel %vm311_vm2, %v2727_v18, -inf }
 0xca9   :  { %v4627_v22 = vpop.f32.mrf.mxu1  ;;  %2830 = vmax.xlane.f32.xlu0 %v2829_v20  ;;  %2827 = vmax.xlane.f32.xlu1 %v2826_v21  ;;  %v4622_v23 = vpop.f32.mrf.mxu0 }
 0xcba   :  { %2896 = vrot.lane.b32.xlu1 %v5354_v31, %s4907_s10 }
 0xcbe   :  { %3048 = vrot.lane.b32.xlu1 %v5356_v34, %s4907_s10 }
 0xcbf   :  { %2972 = vrot.lane.b32.xlu0 %v5366_v42, %s4907_s10 }
 0xcc2   :  { %3124 = vrot.lane.b32.xlu1 %v5374_v46, %s4907_s10 }
 0xcc3   :  { %3276 = vrot.lane.b32.xlu0 %v5370_v44, %s4907_s10 }
 0xcc6   :  { %3200 = vrot.lane.b32.xlu1 %v5360_v57, %s4907_s10 }
 0xd1a   :  { %v2810_v24 = vpop.xlane.xlu1 %2809 }
 0xd1b   :  { %v2832_v25 = vsub.f32 %v2265_v56, %v2810_v24 }
 0xd1d   :  { %v2840_v29 = vmul.f32 1.442695, %v2832_v25 }
 0xd1e   :  { %v2816_v30 = vpop.xlane.xlu0 %2815 }
 0xd1f   :  { %4856 = vpow2.f32 %v2840_v29  ;;  %v2834_v31 = vsub.f32 %v2419_v60, %v2816_v30 }
 0xd21   :  { %v2844_v58 = vmul.f32 1.442695, %v2834_v31 }
 0xd22   :  { %v2813_v34 = vpop.xlane.xlu0 %2812 }
 0xd23   :  { %4858 = vpow2.f32 %v2844_v58  ;;  %v2833_v35 = vsub.f32 %v2342_v2, %v2813_v34 }
 0xd25   :  { %v2842_v38 = vmul.f32 1.442695, %v2833_v35 }
 0xd27   :  { %4860 = vpow2.f32 %v2842_v38 }
 0xd2a   :  { %v2819_v39 = vpop.xlane.xlu0 %2818 }
 0xd2b   :  { %v2835_v42 = vsub.f32 %v2496_v6, %v2819_v39 }
 0xd2c   :  { %v4857_v43 = vpop.eup %4856 }
 0xd2d   :  { %v2846_v0 = vmul.f32 1.442695, %v2835_v42  ;;  %v2856_v44 = vsel %vm311_vm2, %v4857_v43, 0.0 }
 0xd2e   :  { %v2825_v46 = vpop.xlane.xlu0 %2824  ;;  %v2822_v57 = vpop.xlane.xlu1 %2821  ;;  %2857 = vadd.xlane.f32.xlu1 %v2856_v44 }
 0xd2f   :  { %4862 = vpow2.f32 %v2846_v0  ;;  %v2837_v47 = vsub.f32 %v2650_v11, %v2825_v46  ;;  %v2836_v48 = vsub.f32 %v2573_v9, %v2822_v57 }
 0xd30   :  { %v4859_v51 = vpop.eup %4858 }
 0xd31   :  { %v2850_v28 = vmul.f32 1.442695, %v2837_v47  ;;  %v2848_v50 = vmul.f32 1.442695, %v2836_v48  ;;  %v2862_v52 = vsel %vm311_vm2, %v4859_v51, 0.0 }
 0xd32   :  { %v2831_v36 = vpop.xlane.xlu0 %2830  ;;  %2863 = vadd.xlane.f32.xlu1 %v2862_v52  ;;  %v2828_v53 = vpop.xlane.xlu1 %2827 }
 0xd33   :  { %4864 = vpow2.f32 %v2850_v28  ;;  %v2839_v54 = vsub.f32 %v2804_v19, %v2831_v36  ;;  %v2838_v55 = vsub.f32 %v2727_v18, %v2828_v53 }
 0xd34   :  { %v4861_v56 = vpop.eup %4860  ;;  %4866 = vpow2.f32 %v2848_v50 }
 0xd35   :  { %v2854_v59 = vmul.f32 1.442695, %v2839_v54  ;;  %v2852_v41 = vmul.f32 1.442695, %v2838_v55  ;;  %v2859_v60 = vsel %vm311_vm2, %v4861_v56, 0.0 }
 0xd36   :  { %2860 = vadd.xlane.f32.xlu0 %v2859_v60  ;;  %v2973_v62 = vpop.permute.xlu0 %2972  ;;  %v2897_v63 = vpop.permute.xlu1 %2896 }
 0xd37   :  { %4868 = vpow2.f32 %v2854_v59  ;;  %4629 = vmatpush3.msra.mxu0 %v2897_v63  ;;  %4634 = vmatpush3.msra.mxu1 %v2973_v62 }
 0xd38   :  { %4870 = vpow2.f32 %v2852_v41  ;;  %4638 = vmatprep.subr.mxu0 %v4904_v14  ;;  %4643 = vmatprep.subr.mxu1 %v4904_v14  ;;  %v4793_v41 = vld [vmem:[%s5655_s4 + $0x10] sm:$0xff]  }
 0xd3a   :  { %v3049_v15 = vpop.permute.xlu1 %3048  ;;  %v3277_v20 = vpop.permute.xlu0 %3276 }
 0xd3c   :  { %v4863_v2 = vpop.eup %4862 }
 0xd3d   :  { %v2865_v4 = vsel %vm311_vm2, %v4863_v2, 0.0 }
 0xd3e   :  { %2866 = vadd.xlane.f32.xlu0 %v2865_v4  ;;  %v3125_v16 = vpop.permute.xlu1 %3124 }
 0xd40   :  { %v4865_v5 = vpop.eup %4864 }
 0xd41   :  { %v4867_v6 = vpop.eup %4866  ;;  %v2871_v7 = vsel %vm311_vm2, %v4865_v5, 0.0 }
 0xd42   :  { %2872 = vadd.xlane.f32.xlu0 %v2871_v7  ;;  %v2868_v8 = vsel %vm311_vm2, %v4867_v6, 0.0  ;;  %v3201_v18 = vpop.permute.xlu1 %3200 }
 0xd43   :  { %2869 = vadd.xlane.f32.xlu1 %v2868_v8 }
 0xd44   :  { %v5462_v9 = vpop.eup %4868 }
 0xd45   :  { %v5464_v11 = vpop.eup %4870  ;;  %v2877_v12 = vsel %vm311_vm2, %v5462_v9, 0.0 }
 0xd46   :  { %2878 = vadd.xlane.f32.xlu0 %v2877_v12  ;;  %v2874_v13 = vsel %vm311_vm2, %v5464_v11, 0.0 }
 0xd47   :  { %2875 = vadd.xlane.f32.xlu1 %v2874_v13 }
 0xd58   :  { %3352 = vrot.lane.b32.xlu1 %v5362_v37, %s4907_s10 }
 0xd5c   :  { %3428 = vrot.lane.b32.xlu0 %v5378_v1, %s4907_s10 }
 0xdb7   :  { %v2858_v19 = vpop.xlane.xlu1 %2857 }
 0xdb8   :  { %4872 = vrcp.f32 %v2858_v19 }
 0xdbb   :  { %v2864_v21 = vpop.xlane.xlu1 %2863 }
 0xdbc   :  { %4874 = vrcp.f32 %v2864_v21 }
 0xdbf   :  { %v2861_v22 = vpop.xlane.xlu0 %2860 }
 0xdc0   :  { %4876 = vrcp.f32 %v2861_v22 }
 0xdc5   :  { %v4873_v23 = vpop.eup %4872 }
 0xdc6   :  { %v2888_v24 = vmul.f32 %v4873_v23, %v4857_v43 }
 0xdc7   :  { %v2867_v25 = vpop.xlane.xlu0 %2866 }
 0xdc8   :  { %4878 = vrcp.f32 %v2867_v25  ;;  %4631 = vmatmul.mubr.msk.f32.vlgmr.msra.gmra.mxu0 %vm311_vm2, %v2888_v24 }
 0xdc9   :  { %v4875_v37 = vpop.eup %4874  ;;  %4639 = vmatpush3.msra.mxu0 %v3049_v15  ;;  %4640 = vmatprep.mubr.msk.f32.mxu0 %vm4905_vm1, %v4904_v14 }
 0xdca   :  { %4648 = vmatprep.subr.mxu0 %v4904_v14  ;;  %v2890_v1 = vmul.f32 %v4875_v37, %v4859_v51 }
 0xdcb   :  { %v2873_v29 = vpop.xlane.xlu0 %2872 }
 0xdcc   :  { %4880 = vrcp.f32 %v2873_v29  ;;  %v2870_v30 = vpop.xlane.xlu1 %2869  ;;  %4641 = vmatmul.mubr.msk.f32.vlgmr.msra.gmra.mxu0 %vm311_vm2, %v2890_v1 }
 0xdcd   :  { %v4877_v31 = vpop.eup %4876  ;;  %4882 = vrcp.f32 %v2870_v30  ;;  %4649 = vmatpush3.msra.mxu0 %v3201_v18  ;;  %4650 = vmatprep.mubr.msk.f32.mxu0 %vm4905_vm1, %v4904_v14 }
 0xdce   :  { %v2889_v58 = vmul.f32 %v4877_v31, %v4861_v56  ;;  %4658 = vmatprep.subr.mxu0 %v4904_v14  ;;  %v4792_v56 = vld [vmem:[%s5655_s4 + $0x18] sm:$0xff]  }
 0xdcf   :  { %v2879_v34 = vpop.xlane.xlu0 %2878 }
 0xdd0   :  { %4884 = vrcp.f32 %v2879_v34  ;;  %v2876_v35 = vpop.xlane.xlu1 %2875  ;;  %4636 = vmatmul.mubr.msk.f32.vlgmr.msra.gmra.mxu1 %vm311_vm2, %v2889_v58  ;;  %v3601_v58 = vrot.slane %v5320_v10, %v1718_v33 }
 0xdd1   :  { %4886 = vrcp.f32 %v2876_v35  ;;  %4644 = vmatpush3.msra.mxu1 %v3125_v16  ;;  %4645 = vmatprep.mubr.msk.f32.mxu1 %vm4905_vm1, %v4904_v14 }
 0xdd2   :  { %4653 = vmatprep.subr.mxu1 %v4904_v14 }
 0xdd3   :  { %v3429_v46 = vpop.permute.xlu0 %3428 }
 0xdd4   :  { %v3353_v47 = vpop.permute.xlu1 %3352 }
 0xdd5   :  { %v4879_v38 = vpop.eup %4878 }
 0xdd6   :  { %v2891_v39 = vmul.f32 %v4879_v38, %v4863_v2 }
 0xdd8   :  { %4646 = vmatmul.mubr.msk.f32.vlgmr.msra.gmra.mxu1 %vm311_vm2, %v2891_v39 }
 0xdd9   :  { %v4881_v42 = vpop.eup %4880  ;;  %4654 = vmatpush3.msra.mxu1 %v3277_v20  ;;  %4655 = vmatprep.mubr.msk.f32.mxu1 %vm4905_vm1, %v4904_v14 }
 0xdda   :  { %v4883_v43 = vpop.eup %4882  ;;  %4663 = vmatprep.subr.mxu1 %v4904_v14  ;;  %v2893_v0 = vmul.f32 %v4881_v42, %v4865_v5 }
 0xddb   :  { %v2892_v44 = vmul.f32 %v4883_v43, %v4867_v6 }
 0xddc   :  { %4656 = vmatmul.mubr.msk.f32.vlgmr.msra.gmra.mxu1 %vm311_vm2, %v2893_v0 }
 0xddd   :  { %v4885_v57 = vpop.eup %4884  ;;  %4651 = vmatmul.mubr.msk.f32.vlgmr.msra.gmra.mxu0 %vm311_vm2, %v2892_v44  ;;  %4664 = vmatpush3.msra.mxu1 %v3429_v46 }
 0xdde   :  { %v4887_v48 = vpop.eup %4886  ;;  %4659 = vmatpush3.msra.mxu0 %v3353_v47  ;;  %4660 = vmatprep.mubr.msk.f32.mxu0 %vm4905_vm1, %v4904_v14  ;;  %v2895_v51 = vmul.f32 %v4885_v57, %v5462_v9 }
 0xddf   :  { %4665 = vmatprep.mubr.msk.f32.mxu1 %vm4905_vm1, %v4904_v14  ;;  %v2894_v28 = vmul.f32 %v4887_v48, %v5464_v11  ;;  %4668 = vmatprep.subr.bf16.mxu0 %v4904_v14 }
 0xde0   :  { %4666 = vmatmul.mubr.msk.f32.vlgmr.msra.gmra.mxu1 %vm311_vm2, %v2895_v51  ;;  %4676 = vmatprep.subr.bf16.mxu1 %v4904_v14 }
 0xde1   :  { %4661 = vmatmul.mubr.msk.f32.vlgmr.msra.gmra.mxu0 %vm311_vm2, %v2894_v28  ;;  %4680 = vmatprep.mubr.msk.bf16.mxu1 %vm4905_vm1, %v4904_v14 }
 0xde2   :  { %4672 = vmatprep.mubr.msk.bf16.mxu0 %vm4905_vm1, %v4904_v14  ;;  %4669 = vmatpush3.bf16.msra.mxu0 %v4792_v56 }
 0xde3   :  { %4670 = vmatprep.subr.bf16.mxu0 %v4904_v14 }
 0xde6   :  { %4671 = vmatpush3.bf16.msra.mxu0 %v4793_v41 }
 0xde7   :  { %4684 = vmatprep.subr.bf16.mxu0 %v4904_v14 }
 0xe88   :  { %v2968_v50 = vpop.f32.mrf.mxu0 }
 0xe8a   :  { %v4632_v52 = vpop.f32.mrf.mxu0 }
 0xe8c   :  { %v3120_v36 = vpop.f32.mrf.mxu0 }
 0xe8e   :  { %v4642_v53 = vpop.f32.mrf.mxu0 }
 0xe8f   :  { %v4794_v53 = vld [vmem:[%s5656_s5 + $0x18] sm:$0xff]  }
 0xe90   :  { %v3044_v54 = vpop.f32.mrf.mxu1  ;;  %4677 = vmatpush3.bf16.msra.mxu1 %v4794_v53 }
 0xe91   :  { %4678 = vmatprep.subr.bf16.mxu1 %v4904_v14 }
 0xe92   :  { %v4637_v55 = vpop.f32.mrf.mxu1 }
 0xe98   :  { %v3196_v59 = vpop.f32.mrf.mxu1 }
 0xe9a   :  { %v4647_v60 = vpop.f32.mrf.mxu1 }
 0xe9c   :  { %v3348_v62 = vpop.f32.mrf.mxu1 }
 0xe9d   :  { %v3272_v63 = vpop.f32.mrf.mxu0  ;;  %v4758_v2 = vpack.i.bf16 %v3348_v62, %v3044_v54  ;;  %v4795_v54 = vld [vmem:[%s5656_s5 + $0x10] sm:$0xff]  }
 0xe9e   :  { %v4657_v4 = vpop.f32.mrf.mxu1  ;;  %4679 = vmatpush3.bf16.msra.mxu1 %v4795_v54 }
 0xe9f   :  { %v4652_v5 = vpop.f32.mrf.mxu0  ;;  %4759 = vrot.lane.b32.xlu1 %v4758_v2, %s4908_s14  ;;  %4696 = vmatprep.subr.bf16.mxu1 %v4904_v14  ;;  %v3633_v4 = vrot.slane %v5320_v10, %v5248_v61 }
 0xea0   :  { %v3500_v6 = vpop.f32.mrf.mxu1 }
 0xea1   :  { %v3424_v7 = vpop.f32.mrf.mxu0  ;;  %v4763_v8 = vpack.i.bf16 %v3500_v6, %v3196_v59 }
 0xea2   :  { %v4753_v9 = vpack.i.bf16 %v3424_v7, %v3120_v36  ;;  %v4667_v11 = vpop.f32.mrf.mxu1 }
 0xea3   :  { %v4662_v12 = vpop.f32.mrf.mxu0  ;;  %4764 = vrot.lane.b32.xlu1 %v4763_v8, %s4909_s15  ;;  %v3639_v8 = vrot.slane %v5320_v10, %v5253_v3  ;;  %s4911_s15 = smov 64  }
 0xea4   :  { %4754 = vrot.lane.b32.xlu0 %v4753_v9, %s4910_s16 }
 0xf11   :  { %v4760_v13 = vpop.permute.xlu1 %4759 }
 0xf12   :  { %v4762_v15 = vunpack.i.h.bf16 %v4760_v13  ;;  %v4761_v16 = vunpack.i.l.bf16 %v4760_v13 }
 0xf14   :  { %v3516_v24 = vsel %vm311_vm2, %v2968_v50, %v4761_v16  ;;  %v3531_v25 = vsel %vm311_vm2, %v3272_v63, %v4762_v15  ;;  %v4796_v15 = vld [vmem:[%s5657_s6 + $0x38] sm:$0xff]   ;;  %v4797_v16 = vld [vmem:[%s5657_s6 + $0x30] sm:$0xff]  }
 0xf15   :  { %v4765_v18 = vpop.permute.xlu1 %4764 }
 0xf16   :  { %v4767_v19 = vunpack.i.h.bf16 %v4765_v18  ;;  %v4766_v20 = vunpack.i.l.bf16 %v4765_v18  ;;  %v4755_v21 = vpop.permute.xlu0 %4754  ;;  %v4798_v18 = vld [vmem:[%s5657_s6 + $0x28] sm:$0xff]  }
 0xf17   :  { %v4757_v22 = vunpack.i.h.bf16 %v4755_v21  ;;  %v4756_v23 = vunpack.i.l.bf16 %v4755_v21 }
 0xf19   :  { %v3532_v37 = vsel %vm1634_vm3, %v3531_v25, %v4757_v22  ;;  %v3517_v1 = vsel %vm1634_vm3, %v3516_v24, %v4756_v23 }
 0xf1a   :  { %v3533_v29 = vsel %vm1636_vm4, %v3532_v37, %v4767_v19  ;;  %v3518_v30 = vsel %vm1636_vm4, %v3517_v1, %v4766_v20  ;;  %v4799_v19 = vld [vmem:[%s5657_s6 + $0x20] sm:$0xff]   ;;  %v3651_v20 = vrot.slane %v5320_v10, %v1767_v17  ;;  %v4800_v17 = vld [vmem:[%s5658_s7 + $0x8] sm:$0xff]  }
 0xf1b   :  { %v3534_v31 = vpack.c.bf16 %v3533_v29, %v3518_v30 }
 0xf1d   :  { %4673 = vmatmul.mubr.msk.bf16.vlgmr.msra.gmra.mxu0 %vm36_vm0, %v3534_v31 }
 0xf1e   :  { %4692 = vmatprep.mubr.msk.bf16.mxu0 %vm4905_vm1, %v4904_v14  ;;  %4685 = vmatpush3.bf16.msra.mxu0 %v4796_v15 }
 0xf1f   :  { %4686 = vmatprep.subr.bf16.mxu0 %v4904_v14 }
 0xf22   :  { %4687 = vmatpush3.bf16.msra.mxu0 %v4797_v16 }
 0xf23   :  { %4688 = vmatprep.subr.bf16.mxu0 %v4904_v14 }
 0xf26   :  { %4689 = vmatpush3.bf16.msra.mxu0 %v4798_v18 }
 0xf27   :  { %4690 = vmatprep.subr.bf16.mxu0 %v4904_v14 }
 0xf2a   :  { %4691 = vmatpush3.bf16.msra.mxu0 %v4799_v19 }
 0xf2b   :  { %4712 = vmatprep.subr.bf16.mxu0 %v4904_v14 }
 0xfdd   :  { %v3589_v34 = vpop.f32.mrf.mxu0 }
 0xfde   :  { %v3596_v35 = vadd.f32 %v3589_v34, %v5288_v45 }
 0xfdf   :  { %v4674_v38 = vpop.f32.mrf.mxu0 }
 0xfe0   :  { %v5530_v39 = vadd.f32 %v3601_v58, %v3596_v35 }
 0xfe1   :  { %v3592_v42 = vpop.f32.mrf.mxu0 }
 0xfe2   :  { %v3597_v43 = vadd.f32 %v3592_v42, %v5293_v49  ;;  %v3604_v0 = vsel %vm36_vm0, %v5530_v39, 0.0 }
 0xfe3   :  { %3605 = vadd.xlane.f32.xlu0 %v3604_v0  ;;  %v4675_v44 = vpop.f32.mrf.mxu0 }
 0xfe4   :  { %v5535_v46 = vadd.f32 %v3601_v58, %v3597_v43  ;;  %v4801_v44 = vld [vmem:[%s5658_s7] sm:$0xff]  }
 0xfe6   :  { %v3607_v57 = vsel %vm36_vm0, %v5535_v46, 0.0 }
 0xfe7   :  { %3608 = vadd.xlane.f32.xlu1 %v3607_v57  ;;  %v3731_v57 = vrot.slane %v5320_v10, %v1846_v40  ;;  %v4803_v40 = vld [vmem:[%s5658_s7 + $0x28] sm:$0xff]   ;;  %v4804_v10 = vld [vmem:[%s5658_s7 + $0x10] sm:$0xff]  }
0x106c   :  { %v3606_v33 = vpop.xlane.xlu0 %3605 }
0x106d   :  { %v3610_v47 = vmul.f32 0.03125, %v3606_v33 }
0x106f   :  { %v3612_v45 = vsub.f32 %v5530_v39, %v3610_v47 }
0x1070   :  { %v3609_v48 = vpop.xlane.xlu1 %3608 }
0x1071   :  { %v3611_v51 = vmul.f32 0.03125, %v3609_v48  ;;  %v3614_v28 = vmul.f32 %v3612_v45, %v3612_v45 }
0x1073   :  { %v3613_v49 = vsub.f32 %v5535_v46, %v3611_v51  ;;  %v3616_v50 = vsel %vm36_vm0, %v3614_v28, 0.0 }
0x1074   :  { %3617 = vadd.xlane.f32.xlu0 %v3616_v50 }
0x1075   :  { %v3615_v52 = vmul.f32 %v3613_v49, %v3613_v49 }
0x1077   :  { %v3619_v36 = vsel %vm36_vm0, %v3615_v52, 0.0 }
0x1078   :  { %3620 = vadd.xlane.f32.xlu0 %v3619_v36 }
0x10fd   :  { %v3618_v55 = vpop.xlane.xlu0 %3617 }
0x10fe   :  { %v3622_v56 = vmul.f32 0.03125, %v3618_v55 }
0x1100   :  { %v3624_v59 = vadd.f32 1e-05, %v3622_v56 }
0x1101   :  { %v3621_v41 = vpop.xlane.xlu0 %3620 }
0x1102   :  { %4888 = vrsqrt.f32 %v3624_v59  ;;  %v3623_v60 = vmul.f32 0.03125, %v3621_v41 }
0x1104   :  { %v3625_v62 = vadd.f32 1e-05, %v3623_v60 }
0x1106   :  { %4890 = vrsqrt.f32 %v3625_v62 }
0x110f   :  { %v4889_v63 = vpop.eup %4888 }
0x1110   :  { %v3628_v2 = vmul.f32 %v4889_v63, %v3612_v45 }
0x1112   :  { %v3634_v7 = vmul.f32 %v3633_v4, %v3628_v2  ;;  %v4807_v2 = vld [vmem:[%s5658_s7 + $0x30] sm:$0xff]  }
0x1113   :  { %v4891_v5 = vpop.eup %4890 }
0x1114   :  { %v3629_v6 = vmul.f32 %v4891_v5, %v3613_v49  ;;  %v3640_v11 = vadd.f32 %v3639_v8, %v3634_v7 }
0x1116   :  { %v3635_v9 = vmul.f32 %v3633_v4, %v3629_v6 }
0x1118   :  { %v3641_v12 = vadd.f32 %v3639_v8, %v3635_v9 }
0x111a   :  { %v3642_v13 = vpack.c.bf16 %v3641_v12, %v3640_v11 }
0x111c   :  { %4681 = vmatmul.mubr.msk.bf16.vlgmr.msra.gmra.mxu1 %vm36_vm0, %v3642_v13 }
0x111d   :  { %4700 = vmatprep.mubr.msk.bf16.mxu1 %vm4905_vm1, %v4904_v14  ;;  %4697 = vmatpush3.bf16.msra.mxu1 %v4800_v17 }
0x111e   :  { %4698 = vmatprep.subr.bf16.mxu1 %v4904_v14 }
0x1121   :  { %4699 = vmatpush3.bf16.msra.mxu1 %v4801_v44 }
0x1122   :  { %4704 = vmatprep.subr.bf16.mxu1 %v4904_v14 }
0x11dc   :  { %v3701_v21 = vpop.f32.mrf.mxu1 }
0x11dd   :  { %v3702_v22 = vadd.f32 %v3701_v21, %v3651_v20 }
0x11de   :  { %v4682_v23 = vpop.f32.mrf.mxu1 }
0x11df   :  { %v3710_v24 = vmul.f32 0.70710677, %v3702_v22  ;;  %v3708_v34 = vmul.f32 0.5, %v3702_v22 }
0x11e0   :  { %v3704_v25 = vpop.f32.mrf.mxu1 }
0x11e1   :  { %4892 = verf.f32 %v3710_v24  ;;  %v3705_v37 = vadd.f32 %v3704_v25, %v3651_v20 }
0x11e2   :  { %v4683_v1 = vpop.f32.mrf.mxu1 }
0x11e3   :  { %v3711_v29 = vmul.f32 0.70710677, %v3705_v37  ;;  %v3709_v35 = vmul.f32 0.5, %v3705_v37 }
0x11e5   :  { %4894 = verf.f32 %v3711_v29 }
0x11ee   :  { %v4893_v30 = vpop.eup %4892 }
0x11ef   :  { %v3714_v31 = vadd.f32 1.0, %v4893_v30 }
0x11f1   :  { %v3716_v42 = vmul.f32 %v3714_v31, %v3708_v34 }
0x11f2   :  { %v4895_v58 = vpop.eup %4894 }
0x11f3   :  { %v3715_v38 = vadd.f32 1.0, %v4895_v58 }
0x11f5   :  { %v3717_v43 = vmul.f32 %v3715_v38, %v3709_v35 }
0x11f7   :  { %v3718_v0 = vpack.c.bf16 %v3717_v43, %v3716_v42 }
0x11f9   :  { %4693 = vmatmul.mubr.msk.bf16.vlgmr.msra.gmra.mxu0 %vm1872_vm5, %v3718_v0 }
0x11fa   :  { %4716 = vmatprep.mubr.msk.bf16.mxu0 %vm4905_vm1, %v4904_v14  ;;  %4713 = vmatpush3.bf16.msra.mxu0 %v4803_v40 }
0x11fb   :  { %4714 = vmatprep.subr.bf16.mxu0 %v4904_v14 }
0x12b9   :  { %v3793_v33 = vpop.f32.mrf.mxu0 }
0x12ba   :  { %v3794_v45 = vadd.f32 %v3793_v33, %v3731_v57 }
0x12bb   :  { %v4694_v47 = vpop.f32.mrf.mxu0 }
0x12bc   :  { %v3800_v49 = vadd.f32 %v3794_v45, %v5530_v39  ;;  %v4805_v39 = vld [vmem:[%s5658_s7 + $0x20] sm:$0xff]  }
0x12bd   :  { %v3796_v48 = vpop.f32.mrf.mxu0  ;;  %4715 = vmatpush3.bf16.msra.mxu0 %v4805_v39 }
0x12be   :  { %v3797_v51 = vadd.f32 %v3796_v48, %v3731_v57  ;;  %v4034_v48 = vld [vmem:[%s5660_s1] sm:$0xff] }
0x12bf   :  { %v4695_v28 = vpop.f32.mrf.mxu0 }
0x12c0   :  { %v3801_v50 = vadd.f32 %v3797_v51, %v5535_v46  ;;  %v5614_v46 = vld [vmem:[%s5659_s8] sm:$0xf] }
0x12c1   :  { %v3811_v36 = vrot.slane %v5614_v46, %v5007_v27  ;;  %v4806_v27 = vld [vmem:[%s5658_s7 + $0x38] sm:$0xff]   ;;  %v3879_v4 = vrot.slane %v5614_v46, %v5017_v32  ;;  %v3944_v5 = vrot.slane %v5614_v46, %v5248_v61 }
0x12c2   :  { %v3803_v52 = vpack.c.bf16 %v3801_v50, %v3800_v49  ;;  %v4035_v50 = vld [vmem:[%s5660_s1 + $0x8] sm:$0xff]  ;;  %s4913_s1 = smov 96  }
0x12c4   :  { %4701 = vmatmul.mubr.msk.bf16.vlgmr.msra.gmra.mxu1 %vm36_vm0, %v3803_v52 }
0x12c5   :  { %4708 = vmatprep.mubr.msk.bf16.mxu1 %vm4905_vm1, %v4904_v14  ;;  %4705 = vmatpush3.bf16.msra.mxu1 %v4802_v26 }
0x12c6   :  { %4706 = vmatprep.subr.bf16.mxu1 %v4904_v14 }
0x12c9   :  { %4707 = vmatpush3.bf16.msra.mxu1 %v4804_v10 }
0x12ca   :  { %4720 = vmatprep.subr.bf16.mxu1 %v4904_v14 }
0x1384   :  { %v3861_v53 = vpop.f32.mrf.mxu1 }
0x1385   :  { %v3862_v55 = vadd.f32 %v3861_v53, %v3811_v36  ;;  %v4049_v53 = vrot.slane %v5614_v46, %v5253_v3 }
0x1386   :  { %v4702_v54 = vpop.f32.mrf.mxu1 }
0x1387   :  { %v3868_v60 = vmax.f32 %v3862_v55, 0.0 }
0x1388   :  { %v3864_v56 = vpop.f32.mrf.mxu1 }
0x1389   :  { %v3865_v59 = vadd.f32 %v3864_v56, %v3811_v36 }
0x138a   :  { %v4703_v41 = vpop.f32.mrf.mxu1 }
0x138b   :  { %v3869_v62 = vmax.f32 %v3865_v59, 0.0 }
0x138d   :  { %v3870_v63 = vpack.c.bf16 %v3869_v62, %v3868_v60 }
0x138f   :  { %4709 = vmatmul.mubr.msk.bf16.vlgmr.msra.gmra.mxu1 %vm36_vm0, %v3870_v63  ;;  %4717 = vmatmul.mubr.msk.bf16.vlgmr.msra.gmra.mxu0 %vm36_vm0, %v3870_v63 }
0x1390   :  { %4724 = vmatprep.mubr.msk.bf16.mxu1 %vm4905_vm1, %v4904_v14  ;;  %4721 = vmatpush3.bf16.msra.mxu1 %v4806_v27 }
0x1391   :  { %4722 = vmatprep.subr.bf16.mxu1 %v4904_v14 }
0x1394   :  { %4723 = vmatpush3.bf16.msra.mxu1 %v4807_v2 }
0x144f   :  { %v3929_v6 = vpop.f32.mrf.mxu1  ;;  %v3991_v7 = vpop.f32.mrf.mxu0 }
0x1450   :  { %v3930_v8 = vadd.f32 %v3929_v6, %v3879_v4  ;;  %v3992_v9 = vadd.f32 %v3991_v7, %v3944_v5 }
0x1451   :  { %v4710_v11 = vpop.f32.mrf.mxu1  ;;  %v4718_v12 = vpop.f32.mrf.mxu0 }
0x1452   :  { %v4004_v13 = vand.u32 2147483647, %v3992_v9  ;;  %4116 = vrot.lane.b32.xlu1 %v3930_v8, %s4911_s15  ;;  %v3998_v43 = vmax.f32 %v3992_v9, 0.0  ;;  %vm4000_vm7 = vcmp.ne.f32.partialorder %v3992_v9, %v3992_v9 }
0x1453   :  { %v3932_v14 = vpop.f32.mrf.mxu1  ;;  %v3994_v15 = vpop.f32.mrf.mxu0 }
0x1454   :  { %v4006_v16 = vsub.f32 0.0, %v4004_v13  ;;  %v3933_v18 = vadd.f32 %v3932_v14, %v3879_v4  ;;  %v3995_v19 = vadd.f32 %v3994_v15, %v3944_v5 }
0x1455   :  { %v4711_v20 = vpop.f32.mrf.mxu1  ;;  %v4719_v21 = vpop.f32.mrf.mxu0 }
0x1456   :  { %v4008_v32 = vmul.f32 1.442695, %v4006_v16  ;;  %v4005_v22 = vand.u32 2147483647, %v3995_v19  ;;  %4118 = vrot.lane.b32.xlu1 %v3933_v18, %s4911_s15  ;;  %v3999_v51 = vmax.f32 %v3995_v19, 0.0  ;;  %vm4001_vm9 = vcmp.ne.f32.partialorder %v3995_v19, %v3995_v19 }
0x1458   :  { %4896 = vpow2.f32 %v4008_v32  ;;  %v4007_v61 = vsub.f32 0.0, %v4005_v22 }
0x145a   :  { %v4010_v23 = vmul.f32 1.442695, %v4007_v61 }
0x145c   :  { %4898 = vpow2.f32 %v4010_v23 }
0x1465   :  { %v4897_v24 = vpop.eup %4896 }
0x1466   :  { %v4012_v25 = vadd.f32 1.0, %v4897_v24  ;;  %v4015_v29 = vmul.f32 -0.5, %v4897_v24  ;;  %v4018_v58 = vand.u32 2147483647, %v4897_v24 }
0x1468   :  { %4900 = vlog2.f32 %v4012_v25  ;;  %v4016_v30 = vadd.f32 1.0, %v4015_v29  ;;  %vm4019_vm6 = vcmp.lt.f32.partialorder %v4018_v58, 0.0004427343 }
0x1469   :  { %v4899_v37 = vpop.eup %4898 }
0x146a   :  { %v4021_v1 = vadd.f32 1.0, %v4899_v37  ;;  %v4024_v31 = vmul.f32 -0.5, %v4899_v37  ;;  %v4017_v38 = vmul.f32 %v4897_v24, %v4016_v30  ;;  %v4027_v0 = vand.u32 2147483647, %v4899_v37 }
0x146c   :  { %4902 = vlog2.f32 %v4021_v1  ;;  %v4025_v42 = vadd.f32 1.0, %v4024_v31  ;;  %vm4028_vm8 = vcmp.lt.f32.partialorder %v4027_v0, 0.0004427343 }
0x146e   :  { %v4026_v47 = vmul.f32 %v4899_v37, %v4025_v42 }
0x1475   :  { %v4901_v34 = vpop.eup %4900 }
0x1476   :  { %v4014_v35 = vmul.f32 0.6931472, %v4901_v34 }
0x1478   :  { %v4020_v17 = vsel %vm4019_vm6, %v4017_v38, %v4014_v35 }
0x1479   :  { %v4903_v44 = vpop.eup %4902  ;;  %v4030_v57 = vadd.f32 %v4020_v17, %v3998_v43 }
0x147a   :  { %v4023_v33 = vmul.f32 0.6931472, %v4903_v44 }
0x147b   :  { %v4032_v45 = vsel %vm4000_vm7, %v3992_v9, %v4030_v57 }
0x147c   :  { %v4029_v28 = vsel %vm4028_vm8, %v4026_v47, %v4023_v33  ;;  %v4036_v52 = vmul.f32 %v4034_v48, %v4032_v45 }
0x147d   :  { %v4031_v49 = vadd.f32 %v4029_v28, %v3999_v51 }
0x147e   :  { %v4038_v10 = vadd.f32 %v4036_v52, %v3930_v8 }
0x147f   :  { %v4033_v26 = vsel %vm4001_vm9, %v3995_v19, %v4031_v49 }
0x1480   :  { %v4037_v40 = vmul.f32 %v4035_v50, %v4033_v26 }
0x1482   :  { %v4039_v39 = vadd.f32 %v4037_v40, %v3933_v18 }
0x1484   :  { %v4040_v36 = vpack.c.bf16 %v4039_v39, %v4038_v10 }
0x1486   :  { %4725 = vmatmul.mubr.msk.bf16.vlgmr.msra.gmra.mxu1 %vm36_vm0, %v4040_v36 }
0x14c4   :  { %v4117_v62 = vpop.permute.xlu1 %4116 }
0x14c8   :  { %v4119_v63 = vpop.permute.xlu1 %4118 }
0x1546   :  { %v4099_v54 = vpop.f32.mrf.mxu1 }
0x1547   :  { %v4100_v55 = vadd.f32 %v4099_v54, %v4049_v53 }
0x1548   :  { %v4726_v56 = vpop.f32.mrf.mxu1 }
0x1549   :  { %4108 = vrot.lane.b32.xlu0 %v4100_v55, %s4912_s12 }
0x154a   :  { %v4102_v59 = vpop.f32.mrf.mxu1 }
0x154b   :  { %v4103_v41 = vadd.f32 %v4102_v59, %v4049_v53 }
0x154c   :  { %v4727_v60 = vpop.f32.mrf.mxu1 }
0x154d   :  { %4124 = vrot.lane.b32.xlu0 %v4032_v45, %s4913_s1  ;;  %4110 = vrot.lane.b32.xlu1 %v4103_v41, %s4912_s12 }
0x1551   :  { %4126 = vrot.lane.b32.xlu1 %v4033_v26, %s4913_s1 }
0x15bb   :  { %v4109_v27 = vpop.permute.xlu0 %4108 }
0x15bc   :  { %v4130_v2 = vsel %vm36_vm0, %v4038_v10, %v4109_v27 }
0x15bd   :  { %v4132_v3 = vsel %vm1872_vm5, %v4130_v2, %v4117_v62 }
0x15bf   :  { %v4125_v46 = vpop.permute.xlu0 %4124  ;;  %v4111_v4 = vpop.permute.xlu1 %4110 }
0x15c0   :  { %v4135_v5 = vsel %vm4134_vm10, %v4132_v3, %v4125_v46  ;;  %v4131_v6 = vsel %vm36_vm0, %v4039_v39, %v4111_v4 }
0x15c1   :  { %4137 = vst [vmem:[%s5661_s9] sm:$0xff] %v4135_v5  ;;  %v4133_v7 = vsel %vm1872_vm5, %v4131_v6, %v4119_v63 }
0x15c3   :  { %v4127_v8 = vpop.permute.xlu1 %4126 }
0x15c4   :  { %v4136_v9 = vsel %vm4134_vm10, %v4133_v7, %v4127_v8 }
0x15c5   :  { %4138 = vst [vmem:[%s5661_s9 + $0x8] sm:$0xff] %v4136_v9 }

</bundles_post_ra>
